<compile_context>
chip_gen: v6e
topology: v6e:2x2x1
jax: 0.10.0
libtpu: 0.0.40
codegen_flags: <defaults>
</compile_context>

<pallas_src>
import functools

import jax
import jax.numpy as jnp
from jax.experimental import pallas as pl
from jax.experimental.pallas import tpu as pltpu


def _round_up(x, m):
    return ((x + m - 1) // m) * m


def _num_tensorcores_per_chip():
    """v4 (megacore) and v7x expose 2 TensorCores per chip; v5e/v6e have 1."""
    try:
        kind = jax.devices()[0].device_kind.lower()
    except Exception:
        return 1
    return 2 if ("v7" in kind or "v4" in kind) else 1


def _mlp_kernel(x_ref,
                w1_ref, w2_ref, w3_ref, w4_ref,
                b1_ref, b2_ref, b3_ref, b4_ref,
                out_ref):
    """One batch tile: 4 matmuls + 3 ReLUs at native feature widths."""
    h = jnp.dot(x_ref[...], w1_ref[...],
                preferred_element_type=jnp.float32) + b1_ref[...]
    h = jnp.maximum(h, 0.0)

    h = jnp.dot(h, w2_ref[...],
                preferred_element_type=jnp.float32) + b2_ref[...]
    h = jnp.maximum(h, 0.0)

    h = jnp.dot(h, w3_ref[...],
                preferred_element_type=jnp.float32) + b3_ref[...]
    h = jnp.maximum(h, 0.0)

    y = jnp.dot(h, w4_ref[...],
                preferred_element_type=jnp.float32) + b4_ref[...]

    out_ref[...] = y.astype(out_ref.dtype)


def psc_mapping_forward(x, params, tile_b=None):
    """PSC_Mapping_Model forward pass via a single batch-tiled Pallas kernel.

    x:      (B, feature) float32
    params: dict with w1..w4 of shape (in, out) and b1..b4 of shape (1, out)
    tile_b: optional batch tile size; default = whole batch on 1-TC chips,
            half the batch (one tile per core) on 2-TC chips.
    """
    w_list = [params[f"w{i}"].astype(jnp.float32) for i in range(1, 5)]
    b_list = [params[f"b{i}"].reshape(1, -1).astype(jnp.float32)
              for i in range(1, 5)]

    feature = w_list[0].shape[0]
    vector = w_list[3].shape[1]
    dims = [feature] + [w.shape[1] for w in w_list]  # [feature, h1, h2, h3, vector]

    B = x.shape[0]
    b8 = _round_up(B, 8)                    # sublane multiple

    n_cores = _num_tensorcores_per_chip()
    if tile_b is None:
        if n_cores > 1 and b8 >= 8 * n_cores:
            tile_b = _round_up(pl.cdiv(b8, n_cores), 8)   # one tile per core
        else:
            tile_b = b8                                    # single grid step
    else:
        tile_b = max(8, _round_up(tile_b, 8))  # close the (8,128) latent bug
    tile_b = min(tile_b, b8)

    b_pad = _round_up(B, tile_b)
    grid = (b_pad // tile_b,)

    # Only the batch dim is ever padded (feature width stays native).
    x_in = x.astype(jnp.float32)
    if b_pad != B:
        x_in = jnp.pad(x_in, ((0, b_pad - B), (0, 0)))

    # ---- advisory cost estimate reflecting the actual (batch-padded) work ----
    flops = 2 * b_pad * sum(dims[i] * dims[i + 1] for i in range(4))
    bytes_accessed = 4 * (
        b_pad * feature
        + sum(w.size for w in w_list)
        + sum(b.size for b in b_list)
        + b_pad * vector
    )
    cost = pl.CostEstimate(
        flops=flops, transcendentals=0, bytes_accessed=bytes_accessed)

    in_specs = [
        # batch tile of x: streamed / double-buffered per grid step
        pl.BlockSpec((tile_b, feature), lambda i: (i, 0)),
    ]
    # weights / biases: full-array blocks with constant index_map -> fetched
    # once, resident in VMEM across all grid steps (~34 KiB total here).
    in_specs += [pl.BlockSpec(w.shape, lambda i: (0, 0)) for w in w_list]
    in_specs += [pl.BlockSpec(b.shape, lambda i: (0, 0)) for b in b_list]

    out_padded = pl.pallas_call(
        _mlp_kernel,
        out_shape=jax.ShapeDtypeStruct((b_pad, vector), jnp.float32),
        grid=grid,
        in_specs=in_specs,
        out_specs=pl.BlockSpec((tile_b, vector), lambda i: (i, 0)),
        compiler_params=pltpu.CompilerParams(
            dimension_semantics=("parallel",)),
        cost_estimate=cost,
    )(x_in, *w_list, *b_list)

    # Slice away batch padding only (output width is already native).
    if b_pad != B:
        return out_padded[:B]
    return out_padded


def init_params(key, feature, vector, hid1, hid2, hid3):
    """Deterministic synthetic init (uniform +-1/sqrt(fan_in), like nn.Linear)."""
    dims = [(feature, hid1), (hid1, hid2), (hid2, hid3), (hid3, vector)]
    params = {}
    keys = jax.random.split(key, 2 * len(dims))
    for i, (fin, fout) in enumerate(dims):
        bound = 1.0 / jnp.sqrt(jnp.float32(fin))
        params[f"w{i+1}"] = jax.random.uniform(
            keys[2 * i], (fin, fout), jnp.float32, minval=-bound, maxval=bound)
        params[f"b{i+1}"] = jax.random.uniform(
            keys[2 * i + 1], (1, fout), jnp.float32, minval=-bound, maxval=bound)
    return params


def reference_forward(x, p):
    h = jnp.maximum(x @ p["w1"] + p["b1"], 0.0)
    h = jnp.maximum(h @ p["w2"] + p["b2"], 0.0)
    h = jnp.maximum(h @ p["w3"] + p["b3"], 0.0)
    return h @ p["w4"] + p["b4"]


if __name__ == "__main__":
    # Shapes consistent with the module: feature=32, hidden 64/64/32, vector=16.
    B, feature, vector = 512, 32, 16
    hid1, hid2, hid3 = 64, 64, 32

    key = jax.random.PRNGKey(0)
    kx, kp = jax.random.split(key)

    x = jax.random.normal(kx, (B, feature), dtype=jnp.float32)
    params = init_params(kp, feature, vector, hid1, hid2, hid3)

    fwd = jax.jit(psc_mapping_forward)
    out = jax.block_until_ready(fwd(x, params))

    ref = reference_forward(x, params)
    assert out.shape == (B, vector)
    assert jnp.allclose(out, ref, atol=1e-4, rtol=1e-4)

    # Also exercise a non-multiple batch + explicit (unaligned) tile_b to cover
    # the padding / rounding paths.
    x2 = jax.random.normal(kx, (300, feature), dtype=jnp.float32)
    out2 = jax.block_until_ready(psc_mapping_forward(x2, params, tile_b=100))
    assert jnp.allclose(out2, reference_forward(x2, params), atol=1e-4, rtol=1e-4)

    print("KERNEL_OK")
</pallas_src>

<mosaic_0001>
module attributes {stable_mosaic.version = 11 : i64} {
  func.func @_mlp_kernel(%arg0: i32, %arg1: memref<512x32xf32, #tpu.memory_space<vmem>>, %arg2: memref<32x64xf32, #tpu.memory_space<vmem>>, %arg3: memref<64x64xf32, #tpu.memory_space<vmem>>, %arg4: memref<64x32xf32, #tpu.memory_space<vmem>>, %arg5: memref<32x16xf32, #tpu.memory_space<vmem>>, %arg6: memref<1x64xf32, #tpu.memory_space<vmem>>, %arg7: memref<1x64xf32, #tpu.memory_space<vmem>>, %arg8: memref<1x32xf32, #tpu.memory_space<vmem>>, %arg9: memref<1x16xf32, #tpu.memory_space<vmem>>, %arg10: memref<512x16xf32, #tpu.memory_space<vmem>>) attributes {dimension_semantics = [#tpu.dimension_semantics<parallel>], iteration_bounds = array<i64: 1>, scalar_prefetch = 0 : i64, scratch_operands = 0 : i64, tpu.core_type = #tpu.core_type<tc>, window_params = [{transform_indices = @transform_0, window_bounds = array<i64: 512, 32>}, {pipeline_mode = #tpu.pipeline_mode<synchronous>, transform_indices = @transform_1, window_bounds = array<i64: 32, 64>}, {pipeline_mode = #tpu.pipeline_mode<synchronous>, transform_indices = @transform_2, window_bounds = array<i64: 64, 64>}, {pipeline_mode = #tpu.pipeline_mode<synchronous>, transform_indices = @transform_3, window_bounds = array<i64: 64, 32>}, {pipeline_mode = #tpu.pipeline_mode<synchronous>, transform_indices = @transform_4, window_bounds = array<i64: 32, 16>}, {pipeline_mode = #tpu.pipeline_mode<synchronous>, transform_indices = @transform_5, window_bounds = array<i64: 1, 64>}, {pipeline_mode = #tpu.pipeline_mode<synchronous>, transform_indices = @transform_6, window_bounds = array<i64: 1, 64>}, {pipeline_mode = #tpu.pipeline_mode<synchronous>, transform_indices = @transform_7, window_bounds = array<i64: 1, 32>}, {pipeline_mode = #tpu.pipeline_mode<synchronous>, transform_indices = @transform_8, window_bounds = array<i64: 1, 16>}, {transform_indices = @transform_9, window_bounds = array<i64: 512, 16>}]} {
    %c0 = arith.constant 0 : index
    %c0_0 = arith.constant 0 : index
    %0 = vector.load %arg1[%c0, %c0_0] : memref<512x32xf32, #tpu.memory_space<vmem>>, vector<512x32xf32>
    %c0_1 = arith.constant 0 : index
    %c0_2 = arith.constant 0 : index
    %1 = vector.load %arg2[%c0_1, %c0_2] : memref<32x64xf32, #tpu.memory_space<vmem>>, vector<32x64xf32>
    %cst = arith.constant dense<0.000000e+00> : vector<512x64xf32>
    %2 = tpu.matmul %0, %1, %cst {dimension_numbers = #tpu.dot_dimension_numbers<[1], [0], [0], [1], [0, 0, 1, 1], [], []>} : vector<512x32xf32>, vector<32x64xf32>, vector<512x64xf32> -> vector<512x64xf32>
    %c0_3 = arith.constant 0 : index
    %c0_4 = arith.constant 0 : index
    %3 = vector.load %arg6[%c0_3, %c0_4] : memref<1x64xf32, #tpu.memory_space<vmem>>, vector<1x64xf32>
    %4 = vector.broadcast %3 : vector<1x64xf32> to vector<512x64xf32>
    %5 = arith.addf %2, %4 : vector<512x64xf32>
    %cst_5 = arith.constant 0.000000e+00 : f32
    %6 = vector.broadcast %cst_5 : f32 to vector<512x64xf32>
    %7 = arith.maximumf %5, %6 : vector<512x64xf32>
    %c0_6 = arith.constant 0 : index
    %c0_7 = arith.constant 0 : index
    %8 = vector.load %arg3[%c0_6, %c0_7] : memref<64x64xf32, #tpu.memory_space<vmem>>, vector<64x64xf32>
    %cst_8 = arith.constant dense<0.000000e+00> : vector<512x64xf32>
    %9 = tpu.matmul %7, %8, %cst_8 {dimension_numbers = #tpu.dot_dimension_numbers<[1], [0], [0], [1], [0, 0, 1, 1], [], []>} : vector<512x64xf32>, vector<64x64xf32>, vector<512x64xf32> -> vector<512x64xf32>
    %c0_9 = arith.constant 0 : index
    %c0_10 = arith.constant 0 : index
    %10 = vector.load %arg7[%c0_9, %c0_10] : memref<1x64xf32, #tpu.memory_space<vmem>>, vector<1x64xf32>
    %11 = vector.broadcast %10 : vector<1x64xf32> to vector<512x64xf32>
    %12 = arith.addf %9, %11 : vector<512x64xf32>
    %cst_11 = arith.constant 0.000000e+00 : f32
    %13 = vector.broadcast %cst_11 : f32 to vector<512x64xf32>
    %14 = arith.maximumf %12, %13 : vector<512x64xf32>
    %c0_12 = arith.constant 0 : index
    %c0_13 = arith.constant 0 : index
    %15 = vector.load %arg4[%c0_12, %c0_13] : memref<64x32xf32, #tpu.memory_space<vmem>>, vector<64x32xf32>
    %cst_14 = arith.constant dense<0.000000e+00> : vector<512x32xf32>
    %16 = tpu.matmul %14, %15, %cst_14 {dimension_numbers = #tpu.dot_dimension_numbers<[1], [0], [0], [1], [0, 0, 1, 1], [], []>} : vector<512x64xf32>, vector<64x32xf32>, vector<512x32xf32> -> vector<512x32xf32>
    %c0_15 = arith.constant 0 : index
    %c0_16 = arith.constant 0 : index
    %17 = vector.load %arg8[%c0_15, %c0_16] : memref<1x32xf32, #tpu.memory_space<vmem>>, vector<1x32xf32>
    %18 = vector.broadcast %17 : vector<1x32xf32> to vector<512x32xf32>
    %19 = arith.addf %16, %18 : vector<512x32xf32>
    %cst_17 = arith.constant 0.000000e+00 : f32
    %20 = vector.broadcast %cst_17 : f32 to vector<512x32xf32>
    %21 = arith.maximumf %19, %20 : vector<512x32xf32>
    %c0_18 = arith.constant 0 : index
    %c0_19 = arith.constant 0 : index
    %22 = vector.load %arg5[%c0_18, %c0_19] : memref<32x16xf32, #tpu.memory_space<vmem>>, vector<32x16xf32>
    %cst_20 = arith.constant dense<0.000000e+00> : vector<512x16xf32>
    %23 = tpu.matmul %21, %22, %cst_20 {dimension_numbers = #tpu.dot_dimension_numbers<[1], [0], [0], [1], [0, 0, 1, 1], [], []>} : vector<512x32xf32>, vector<32x16xf32>, vector<512x16xf32> -> vector<512x16xf32>
    %c0_21 = arith.constant 0 : index
    %c0_22 = arith.constant 0 : index
    %24 = vector.load %arg9[%c0_21, %c0_22] : memref<1x16xf32, #tpu.memory_space<vmem>>, vector<1x16xf32>
    %25 = vector.broadcast %24 : vector<1x16xf32> to vector<512x16xf32>
    %26 = arith.addf %23, %25 : vector<512x16xf32>
    %c0_23 = arith.constant 0 : index
    %c0_24 = arith.constant 0 : index
    %27 = vector.load %arg10[%c0_23, %c0_24] : memref<512x16xf32, #tpu.memory_space<vmem>>, vector<512x16xf32>
    tpu.vector_store %arg10[%c0_23, %c0_24], %26 {strides = array<i32>} : memref<512x16xf32, #tpu.memory_space<vmem>>, vector<512x16xf32>,
    return
  }
  func.func @transform_0(%arg0: i32) -> (i32, i32) {
    %c0_i32 = arith.constant 0 : i32
    %c0_i32_0 = arith.constant 0 : i32
    return %arg0, %c0_i32 : i32, i32
  }
  func.func @transform_1(%arg0: i32) -> (i32, i32) {
    %c0_i32 = arith.constant 0 : i32
    %c0_i32_0 = arith.constant 0 : i32
    %c0_i32_1 = arith.constant 0 : i32
    return %c0_i32, %c0_i32_0 : i32, i32
  }
  func.func @transform_2(%arg0: i32) -> (i32, i32) {
    %c0_i32 = arith.constant 0 : i32
    %c0_i32_0 = arith.constant 0 : i32
    %c0_i32_1 = arith.constant 0 : i32
    return %c0_i32, %c0_i32_0 : i32, i32
  }
  func.func @transform_3(%arg0: i32) -> (i32, i32) {
    %c0_i32 = arith.constant 0 : i32
    %c0_i32_0 = arith.constant 0 : i32
    %c0_i32_1 = arith.constant 0 : i32
    return %c0_i32, %c0_i32_0 : i32, i32
  }
  func.func @transform_4(%arg0: i32) -> (i32, i32) {
    %c0_i32 = arith.constant 0 : i32
    %c0_i32_0 = arith.constant 0 : i32
    %c0_i32_1 = arith.constant 0 : i32
    return %c0_i32, %c0_i32_0 : i32, i32
  }
  func.func @transform_5(%arg0: i32) -> (i32, i32) {
    %c0_i32 = arith.constant 0 : i32
    %c0_i32_0 = arith.constant 0 : i32
    %c0_i32_1 = arith.constant 0 : i32
    return %c0_i32, %c0_i32_0 : i32, i32
  }
  func.func @transform_6(%arg0: i32) -> (i32, i32) {
    %c0_i32 = arith.constant 0 : i32
    %c0_i32_0 = arith.constant 0 : i32
    %c0_i32_1 = arith.constant 0 : i32
    return %c0_i32, %c0_i32_0 : i32, i32
  }
  func.func @transform_7(%arg0: i32) -> (i32, i32) {
    %c0_i32 = arith.constant 0 : i32
    %c0_i32_0 = arith.constant 0 : i32
    %c0_i32_1 = arith.constant 0 : i32
    return %c0_i32, %c0_i32_0 : i32, i32
  }
  func.func @transform_8(%arg0: i32) -> (i32, i32) {
    %c0_i32 = arith.constant 0 : i32
    %c0_i32_0 = arith.constant 0 : i32
    %c0_i32_1 = arith.constant 0 : i32
    return %c0_i32, %c0_i32_0 : i32, i32
  }
  func.func @transform_9(%arg0: i32) -> (i32, i32) {
    %c0_i32 = arith.constant 0 : i32
    %c0_i32_0 = arith.constant 0 : i32
    return %arg0, %c0_i32 : i32, i32
  }
}

</mosaic_0001>

<bundles_post_ra>
// kernel: psc_mapping_forward.1
= control target key start
LH: loop header
LB: loop body
LE: loop exit
PB: predicated region body
PF: predicated region fallthrough
CT: control target
= control target key end

     0   :  { %vm107_vm0 = vcmask 261120   ;;  %vm764_vm1 = vcmask 523264   ;;  %vm2650_vm2 = vcmask 130048   ;;  %s4801_s1 = inlined_call_operand.vmem [shape: f32[32,64], index: 1, kind: input, shape index: {}]   ;;  %s4802_s0 = inlined_call_operand.vmem [shape: f32[512,32], index: 0, kind: input, shape index: {}]   ;;  %s4803_s2 = inlined_call_operand.vmem [shape: f32[64,64], index: 2, kind: input, shape index: {}]   ;;  %s4804_s3 = inlined_call_operand.vmem [shape: f32[64,32], index: 3, kind: input, shape index: {}]   ;;  %s4805_s5 = inlined_call_operand.vmem [shape: f32[1,64], index: 5, kind: input, shape index: {}]   ;;  %s4806_s4 = inlined_call_operand.vmem [shape: f32[32,16], index: 4, kind: input, shape index: {}]   ;;  %s4807_s6 = inlined_call_operand.vmem [shape: f32[1,64], index: 6, kind: input, shape index: {}]   ;;  %s4808_s7 = inlined_call_operand.vmem [shape: f32[1,32], index: 7, kind: input, shape index: {}]   ;;  %s4809_s8 = inlined_call_operand.vmem [shape: f32[1,16], index: 8, kind: input, shape index: {}]   ;;  %s4810_s9 = inlined_call_operand.vmem [shape: f32[512,16], index: 9, kind: output, shape index: {}]  }
   0x1   :  { %v99_v0 = vld [vmem:[%s4801_s1 + $0x18] sm:$0xff]  ;;  %v98_v1 = vld [vmem:[%s4801_s1 + $0x10] sm:$0xff]  ;;  %v32_v2 = vld [vmem:[%s4802_s0] sm:$0xff] }
   0x2   :  { %3259 = vmatprep.subr.mxu0 %v99_v0  ;;  %v97_v3 = vld [vmem:[%s4801_s1 + $0x8] sm:$0xff]  ;;  %3267 = vmatprep.mubr.msk.f32.mxu0 %vm107_vm0, %v32_v2  ;;  %v96_v4 = vld [vmem:[%s4801_s1] sm:$0xff]  ;;  %v34_v6 = vld [vmem:[%s4802_s0 + $0x10] sm:$0xff] }
   0x3   :  { %3260 = vmatpush3.msra.mxu0 %v99_v0  ;;  %v33_v5 = vld [vmem:[%s4802_s0 + $0x8] sm:$0xff]  ;;  %v35_v7 = vld [vmem:[%s4802_s0 + $0x18] sm:$0xff]  ;;  %v36_v8 = vld [vmem:[%s4802_s0 + $0x20] sm:$0xff] }
   0x4   :  { %3261 = vmatprep.subr.mxu0 %v98_v1  ;;  %v37_v9 = vld [vmem:[%s4802_s0 + $0x28] sm:$0xff]  ;;  %v38_v10 = vld [vmem:[%s4802_s0 + $0x30] sm:$0xff]  ;;  %v39_v11 = vld [vmem:[%s4802_s0 + $0x38] sm:$0xff] }
   0x5   :  { %3262 = vmatpush3.msra.mxu0 %v98_v1  ;;  %v40_v12 = vld [vmem:[%s4802_s0 + $0x40] sm:$0xff]  ;;  %v41_v13 = vld [vmem:[%s4802_s0 + $0x48] sm:$0xff]  ;;  %v756_v14 = vld [vmem:[%s4803_s2 + $0x38] sm:$0xff] }
   0x6   :  { %3263 = vmatprep.subr.mxu0 %v97_v3  ;;  %v42_v15 = vld [vmem:[%s4802_s0 + $0x50] sm:$0xff]  ;;  %3363 = vmatprep.subr.mxu1 %v756_v14  ;;  %v754_v17 = vld [vmem:[%s4803_s2 + $0x28] sm:$0xff]  ;;  %v43_v18 = vld [vmem:[%s4802_s0 + $0x58] sm:$0xff] }
   0x7   :  { %3264 = vmatpush3.msra.mxu0 %v97_v3  ;;  %v755_v16 = vld [vmem:[%s4803_s2 + $0x30] sm:$0xff]  ;;  %3364 = vmatpush3.msra.mxu1 %v756_v14  ;;  %v753_v19 = vld [vmem:[%s4803_s2 + $0x20] sm:$0xff]  ;;  %v45_v21 = vld [vmem:[%s4802_s0 + $0x68] sm:$0xff] }
   0x8   :  { %3265 = vmatprep.subr.mxu0 %v96_v4  ;;  %3365 = vmatprep.subr.mxu1 %v755_v16  ;;  %v44_v20 = vld [vmem:[%s4802_s0 + $0x60] sm:$0xff]  ;;  %v46_v22 = vld [vmem:[%s4802_s0 + $0x70] sm:$0xff]  ;;  %v47_v23 = vld [vmem:[%s4802_s0 + $0x78] sm:$0xff] }
   0x9   :  { %3266 = vmatpush3.msra.mxu0 %v96_v4  ;;  %3366 = vmatpush3.msra.mxu1 %v755_v16  ;;  %v48_v24 = vld [vmem:[%s4802_s0 + $0x80] sm:$0xff]  ;;  %v49_v25 = vld [vmem:[%s4802_s0 + $0x88] sm:$0xff]  ;;  %v50_v26 = vld [vmem:[%s4802_s0 + $0x90] sm:$0xff] }
   0xa   :  { %3268 = vmatmul.mubr.msk.f32.vlgmr.msra.gmra.mxu0 %vm107_vm0, %v33_v5  ;;  %3367 = vmatprep.subr.mxu1 %v754_v17  ;;  %v51_v27 = vld [vmem:[%s4802_s0 + $0x98] sm:$0xff]  ;;  %v52_v28 = vld [vmem:[%s4802_s0 + $0xa0] sm:$0xff]  ;;  %v53_v29 = vld [vmem:[%s4802_s0 + $0xa8] sm:$0xff] }
   0xb   :  { %3270 = vmatprep.mubr.msk.f32.mxu0 %vm107_vm0, %v34_v6  ;;  %3368 = vmatpush3.msra.mxu1 %v754_v17  ;;  %v54_v30 = vld [vmem:[%s4802_s0 + $0xb0] sm:$0xff]  ;;  %v55_v31 = vld [vmem:[%s4802_s0 + $0xb8] sm:$0xff]  ;;  %v56_v32 = vld [vmem:[%s4802_s0 + $0xc0] sm:$0xff] }
   0xc   :  { %3369 = vmatprep.subr.mxu1 %v753_v19  ;;  %v57_v33 = vld [vmem:[%s4802_s0 + $0xc8] sm:$0xff]  ;;  %v58_v34 = vld [vmem:[%s4802_s0 + $0xd0] sm:$0xff]  ;;  %v59_v35 = vld [vmem:[%s4802_s0 + $0xd8] sm:$0xff] }
   0xd   :  { %3370 = vmatpush3.msra.mxu1 %v753_v19  ;;  %v60_v36 = vld [vmem:[%s4802_s0 + $0xe0] sm:$0xff]  ;;  %v61_v37 = vld [vmem:[%s4802_s0 + $0xe8] sm:$0xff]  ;;  %v62_v38 = vld [vmem:[%s4802_s0 + $0xf0] sm:$0xff] }
   0xe   :  { %3271 = vmatmul.mubr.msk.f32.gmra.mxu0 %vm107_vm0, %v35_v7  ;;  %v63_v39 = vld [vmem:[%s4802_s0 + $0xf8] sm:$0xff]  ;;  %v64_v40 = vld [vmem:[%s4802_s0 + $0x100] sm:$0xff]  ;;  %v65_v41 = vld [vmem:[%s4802_s0 + $0x108] sm:$0xff] }
   0xf   :  { %3273 = vmatprep.mubr.msk.f32.mxu0 %vm107_vm0, %v36_v8  ;;  %v66_v42 = vld [vmem:[%s4802_s0 + $0x110] sm:$0xff]  ;;  %v752_v43 = vld [vmem:[%s4803_s2 + $0x18] sm:$0xff]  ;;  %v68_v46 = vld [vmem:[%s4802_s0 + $0x120] sm:$0xff] }
  0x10   :  { %3371 = vmatprep.subr.mxu1 %v752_v43  ;;  %v67_v44 = vld [vmem:[%s4802_s0 + $0x118] sm:$0xff]  ;;  %v751_v45 = vld [vmem:[%s4803_s2 + $0x10] sm:$0xff]  ;;  %v750_v47 = vld [vmem:[%s4803_s2 + $0x8] sm:$0xff] }
  0x11   :  { %3372 = vmatpush3.msra.mxu1 %v752_v43  ;;  %v69_v48 = vld [vmem:[%s4802_s0 + $0x128] sm:$0xff]  ;;  %v749_v49 = vld [vmem:[%s4803_s2] sm:$0xff]  ;;  %v70_v50 = vld [vmem:[%s4802_s0 + $0x130] sm:$0xff] }
  0x12   :  { %3274 = vmatmul.mubr.msk.f32.gmra.mxu0 %vm107_vm0, %v37_v9  ;;  %3373 = vmatprep.subr.mxu1 %v751_v45  ;;  %v71_v51 = vld [vmem:[%s4802_s0 + $0x138] sm:$0xff]  ;;  %v72_v52 = vld [vmem:[%s4802_s0 + $0x140] sm:$0xff]  ;;  %v73_v53 = vld [vmem:[%s4802_s0 + $0x148] sm:$0xff] }
  0x13   :  { %3276 = vmatprep.mubr.msk.f32.mxu0 %vm107_vm0, %v38_v10  ;;  %3374 = vmatpush3.msra.mxu1 %v751_v45  ;;  %v74_v54 = vld [vmem:[%s4802_s0 + $0x150] sm:$0xff]  ;;  %v75_v55 = vld [vmem:[%s4802_s0 + $0x158] sm:$0xff]  ;;  %v76_v56 = vld [vmem:[%s4802_s0 + $0x160] sm:$0xff] }
  0x14   :  { %3375 = vmatprep.subr.mxu1 %v750_v47  ;;  %v77_v57 = vld [vmem:[%s4802_s0 + $0x168] sm:$0xff]  ;;  %v78_v58 = vld [vmem:[%s4802_s0 + $0x170] sm:$0xff]  ;;  %v79_v59 = vld [vmem:[%s4802_s0 + $0x178] sm:$0xff] }
  0x15   :  { %3376 = vmatpush3.msra.mxu1 %v750_v47  ;;  %v80_v60 = vld [vmem:[%s4802_s0 + $0x180] sm:$0xff]  ;;  %v81_v61 = vld [vmem:[%s4802_s0 + $0x188] sm:$0xff]  ;;  %v82_v62 = vld [vmem:[%s4802_s0 + $0x190] sm:$0xff] }
  0x16   :  { %3277 = vmatmul.mubr.msk.f32.gmra.mxu0 %vm107_vm0, %v39_v11  ;;  %3377 = vmatprep.subr.mxu1 %v749_v49  ;;  %v83_v63 = vld [vmem:[%s4802_s0 + $0x198] sm:$0xff]  ;;  %v84_v0 = vld [vmem:[%s4802_s0 + $0x1a0] sm:$0xff]  ;;  %v85_v1 = vld [vmem:[%s4802_s0 + $0x1a8] sm:$0xff] }
  0x17   :  { %3279 = vmatprep.mubr.msk.f32.mxu0 %vm107_vm0, %v40_v12  ;;  %3378 = vmatpush3.msra.mxu1 %v749_v49  ;;  %v86_v2 = vld [vmem:[%s4802_s0 + $0x1b0] sm:$0xff]  ;;  %v87_v3 = vld [vmem:[%s4802_s0 + $0x1b8] sm:$0xff]  ;;  %v88_v4 = vld [vmem:[%s4802_s0 + $0x1c0] sm:$0xff] }
  0x18   :  { %v89_v5 = vld [vmem:[%s4802_s0 + $0x1c8] sm:$0xff]  ;;  %v90_v6 = vld [vmem:[%s4802_s0 + $0x1d0] sm:$0xff]  ;;  %v91_v7 = vld [vmem:[%s4802_s0 + $0x1d8] sm:$0xff] }
  0x19   :  { %v92_v8 = vld [vmem:[%s4802_s0 + $0x1e0] sm:$0xff]  ;;  %v93_v9 = vld [vmem:[%s4802_s0 + $0x1e8] sm:$0xff]  ;;  %v94_v10 = vld [vmem:[%s4802_s0 + $0x1f0] sm:$0xff] }
  0x1a   :  { %3280 = vmatmul.mubr.msk.f32.gmra.mxu0 %vm107_vm0, %v41_v13  ;;  %v95_v11 = vld [vmem:[%s4802_s0 + $0x1f8] sm:$0xff]  ;;  %v1412_v13 = vld [vmem:[%s4804_s3 + $0x30] sm:$0xff]  ;;  %v1411_v14 = vld [vmem:[%s4804_s3 + $0x28] sm:$0xff] }
  0x1b   :  { %3282 = vmatprep.mubr.msk.f32.mxu0 %vm107_vm0, %v42_v15  ;;  %v1413_v12 = vld [vmem:[%s4804_s3 + $0x38] sm:$0xff]  ;;  %v4053_v15 = vld [vmem:[%s4805_s5] ss:$0 sm:$0xff] }
  0x1c   :  { %3475 = vmatprep.subr.mxu0 %v1413_v12  ;;  %v1410_v17 = vld [vmem:[%s4804_s3 + $0x20] sm:$0xff] }
  0x1d   :  { %3476 = vmatpush3.msra.mxu0 %v1413_v12 }
  0x1e   :  { %3283 = vmatmul.mubr.msk.f32.gmra.mxu0 %vm107_vm0, %v43_v18  ;;  %3477 = vmatprep.subr.mxu0 %v1412_v13 }
  0x1f   :  { %3285 = vmatprep.mubr.msk.f32.mxu0 %vm107_vm0, %v44_v20  ;;  %3478 = vmatpush3.msra.mxu0 %v1412_v13 }
  0x20   :  { %3479 = vmatprep.subr.mxu0 %v1411_v14 }
  0x21   :  { %3480 = vmatpush3.msra.mxu0 %v1411_v14 }
  0x22   :  { %3286 = vmatmul.mubr.msk.f32.gmra.mxu0 %vm107_vm0, %v45_v21  ;;  %3481 = vmatprep.subr.mxu0 %v1410_v17 }
  0x23   :  { %3288 = vmatprep.mubr.msk.f32.mxu0 %vm107_vm0, %v46_v22  ;;  %3482 = vmatpush3.msra.mxu0 %v1410_v17  ;;  %v1409_v22 = vld [vmem:[%s4804_s3 + $0x18] sm:$0xff] }
  0x24   :  { %3483 = vmatprep.subr.mxu0 %v1409_v22 }
  0x25   :  { %3484 = vmatpush3.msra.mxu0 %v1409_v22 }
  0x26   :  { %3289 = vmatmul.mubr.msk.f32.gmra.mxu0 %vm107_vm0, %v47_v23  ;;  %v1408_v23 = vld [vmem:[%s4804_s3 + $0x10] sm:$0xff] }
  0x27   :  { %3291 = vmatprep.mubr.msk.f32.mxu0 %vm107_vm0, %v48_v24  ;;  %3485 = vmatprep.subr.mxu0 %v1408_v23 }
  0x28   :  { %3486 = vmatpush3.msra.mxu0 %v1408_v23 }
  0x2a   :  { %3292 = vmatmul.mubr.msk.f32.gmra.mxu0 %vm107_vm0, %v49_v25 }
  0x2b   :  { %3294 = vmatprep.mubr.msk.f32.mxu0 %vm107_vm0, %v50_v26 }
  0x2e   :  { %3295 = vmatmul.mubr.msk.f32.gmra.mxu0 %vm107_vm0, %v51_v27 }
  0x2f   :  { %3297 = vmatprep.mubr.msk.f32.mxu0 %vm107_vm0, %v52_v28  ;;  %v1407_v28 = vld [vmem:[%s4804_s3 + $0x8] sm:$0xff] }
  0x30   :  { %3487 = vmatprep.subr.mxu0 %v1407_v28 }
  0x31   :  { %3488 = vmatpush3.msra.mxu0 %v1407_v28 }
  0x32   :  { %3298 = vmatmul.mubr.msk.f32.gmra.mxu0 %vm107_vm0, %v53_v29 }
  0x33   :  { %3300 = vmatprep.mubr.msk.f32.mxu0 %vm107_vm0, %v54_v30 }
  0x36   :  { %3301 = vmatmul.mubr.msk.f32.gmra.mxu0 %vm107_vm0, %v55_v31  ;;  %v1406_v31 = vld [vmem:[%s4804_s3] sm:$0xff] }
  0x37   :  { %3303 = vmatprep.mubr.msk.f32.mxu0 %vm107_vm0, %v56_v32  ;;  %3489 = vmatprep.subr.mxu0 %v1406_v31 }
  0x38   :  { %3490 = vmatpush3.msra.mxu0 %v1406_v31 }
  0x3a   :  { %3304 = vmatmul.mubr.msk.f32.gmra.mxu0 %vm107_vm0, %v57_v33 }
  0x3b   :  { %3306 = vmatprep.mubr.msk.f32.mxu0 %vm107_vm0, %v58_v34 }
  0x3e   :  { %3307 = vmatmul.mubr.msk.f32.gmra.mxu0 %vm107_vm0, %v59_v35 }
  0x3f   :  { %3309 = vmatprep.mubr.msk.f32.mxu0 %vm107_vm0, %v60_v36 }
  0x42   :  { %3310 = vmatmul.mubr.msk.f32.gmra.mxu0 %vm107_vm0, %v61_v37 }
  0x43   :  { %3312 = vmatprep.mubr.msk.f32.mxu0 %vm107_vm0, %v62_v38 }
  0x46   :  { %3313 = vmatmul.mubr.msk.f32.gmra.mxu0 %vm107_vm0, %v63_v39 }
  0x47   :  { %3315 = vmatprep.mubr.msk.f32.mxu0 %vm107_vm0, %v64_v40 }
  0x4a   :  { %3316 = vmatmul.mubr.msk.f32.gmra.mxu0 %vm107_vm0, %v65_v41 }
  0x4b   :  { %3318 = vmatprep.mubr.msk.f32.mxu0 %vm107_vm0, %v66_v42 }
  0x4e   :  { %3319 = vmatmul.mubr.msk.f32.gmra.mxu0 %vm107_vm0, %v67_v44 }
  0x4f   :  { %3321 = vmatprep.mubr.msk.f32.mxu0 %vm107_vm0, %v68_v46 }
  0x52   :  { %3322 = vmatmul.mubr.msk.f32.gmra.mxu0 %vm107_vm0, %v69_v48 }
  0x53   :  { %3324 = vmatprep.mubr.msk.f32.mxu0 %vm107_vm0, %v70_v50 }
  0x56   :  { %3325 = vmatmul.mubr.msk.f32.gmra.mxu0 %vm107_vm0, %v71_v51 }
  0x57   :  { %3327 = vmatprep.mubr.msk.f32.mxu0 %vm107_vm0, %v72_v52 }
  0x5a   :  { %3328 = vmatmul.mubr.msk.f32.gmra.mxu0 %vm107_vm0, %v73_v53 }
  0x5b   :  { %3330 = vmatprep.mubr.msk.f32.mxu0 %vm107_vm0, %v74_v54 }
  0x5e   :  { %3331 = vmatmul.mubr.msk.f32.gmra.mxu0 %vm107_vm0, %v75_v55 }
  0x5f   :  { %3333 = vmatprep.mubr.msk.f32.mxu0 %vm107_vm0, %v76_v56 }
  0x62   :  { %3334 = vmatmul.mubr.msk.f32.gmra.mxu0 %vm107_vm0, %v77_v57 }
  0x63   :  { %3336 = vmatprep.mubr.msk.f32.mxu0 %vm107_vm0, %v78_v58 }
  0x66   :  { %3337 = vmatmul.mubr.msk.f32.gmra.mxu0 %vm107_vm0, %v79_v59 }
  0x67   :  { %3339 = vmatprep.mubr.msk.f32.mxu0 %vm107_vm0, %v80_v60 }
  0x6a   :  { %3340 = vmatmul.mubr.msk.f32.gmra.mxu0 %vm107_vm0, %v81_v61 }
  0x6b   :  { %3342 = vmatprep.mubr.msk.f32.mxu0 %vm107_vm0, %v82_v62 }
  0x6e   :  { %3343 = vmatmul.mubr.msk.f32.gmra.mxu0 %vm107_vm0, %v83_v63 }
  0x6f   :  { %3345 = vmatprep.mubr.msk.f32.mxu0 %vm107_vm0, %v84_v0 }
  0x72   :  { %3346 = vmatmul.mubr.msk.f32.gmra.mxu0 %vm107_vm0, %v85_v1 }
  0x73   :  { %3348 = vmatprep.mubr.msk.f32.mxu0 %vm107_vm0, %v86_v2 }
  0x76   :  { %3349 = vmatmul.mubr.msk.f32.gmra.mxu0 %vm107_vm0, %v87_v3 }
  0x77   :  { %3351 = vmatprep.mubr.msk.f32.mxu0 %vm107_vm0, %v88_v4 }
  0x7a   :  { %3352 = vmatmul.mubr.msk.f32.gmra.mxu0 %vm107_vm0, %v89_v5 }
  0x7b   :  { %3354 = vmatprep.mubr.msk.f32.mxu0 %vm107_vm0, %v90_v6 }
  0x7e   :  { %3355 = vmatmul.mubr.msk.f32.gmra.mxu0 %vm107_vm0, %v91_v7 }
  0x7f   :  { %3357 = vmatprep.mubr.msk.f32.mxu0 %vm107_vm0, %v92_v8 }
  0x82   :  { %3358 = vmatmul.mubr.msk.f32.gmra.mxu0 %vm107_vm0, %v93_v9 }
  0x83   :  { %3360 = vmatprep.mubr.msk.f32.mxu0 %vm107_vm0, %v94_v10 }
  0x86   :  { %3361 = vmatmul.mubr.msk.f32.gmra.mxu0 %vm107_vm0, %v95_v11 }
  0xca   :  { %v3269_v16 = vpop.f32.mrf.mxu0 }
  0xcb   :  { %v372_v18 = vadd.f32 %v3269_v16, %v4053_v15 }
  0xcc   :  { %v366_v19 = vpop.f32.mrf.mxu0 }
  0xcd   :  { %v367_v20 = vadd.f32 %v4053_v15, %v366_v19  ;;  %v686_v25 = vmax.f32 %v372_v18, 0.0 }
  0xce   :  { %v3272_v21 = vpop.f32.mrf.mxu0 }
  0xcf   :  { %v685_v24 = vmax.f32 %v367_v20, 0.0  ;;  %v382_v26 = vadd.f32 %v3272_v21, %v4053_v15 }
  0xd0   :  { %v376_v27 = vpop.f32.mrf.mxu0 }
  0xd1   :  { %v377_v29 = vadd.f32 %v4053_v15, %v376_v27  ;;  %3379 = vmatprep.mubr.msk.f32.mxu1 %vm764_vm1, %v685_v24  ;;  %v688_v33 = vmax.f32 %v382_v26, 0.0 }
  0xd2   :  { %v3275_v30 = vpop.f32.mrf.mxu0  ;;  %3380 = vmatmul.mubr.msk.f32.vlgmr.msra.gmra.mxu1 %vm764_vm1, %v686_v25 }
  0xd3   :  { %v687_v32 = vmax.f32 %v377_v29, 0.0  ;;  %v392_v34 = vadd.f32 %v3275_v30, %v4053_v15 }
  0xd4   :  { %v386_v35 = vpop.f32.mrf.mxu0 }
  0xd5   :  { %v387_v36 = vadd.f32 %v4053_v15, %v386_v35  ;;  %3382 = vmatprep.mubr.msk.f32.mxu1 %vm764_vm1, %v687_v32  ;;  %v690_v39 = vmax.f32 %v392_v34, 0.0 }
  0xd6   :  { %v3278_v37 = vpop.f32.mrf.mxu0  ;;  %3383 = vmatmul.mubr.msk.f32.gmra.mxu1 %vm764_vm1, %v688_v33 }
  0xd7   :  { %v689_v38 = vmax.f32 %v387_v36, 0.0  ;;  %v402_v40 = vadd.f32 %v3278_v37, %v4053_v15 }
  0xd8   :  { %v396_v41 = vpop.f32.mrf.mxu0 }
  0xd9   :  { %v397_v42 = vadd.f32 %v4053_v15, %v396_v41  ;;  %3385 = vmatprep.mubr.msk.f32.mxu1 %vm764_vm1, %v689_v38  ;;  %v692_v45 = vmax.f32 %v402_v40, 0.0 }
  0xda   :  { %v3281_v43 = vpop.f32.mrf.mxu0  ;;  %3386 = vmatmul.mubr.msk.f32.gmra.mxu1 %vm764_vm1, %v690_v39 }
  0xdb   :  { %v691_v44 = vmax.f32 %v397_v42, 0.0  ;;  %v412_v46 = vadd.f32 %v3281_v43, %v4053_v15 }
  0xdc   :  { %v406_v47 = vpop.f32.mrf.mxu0 }
  0xdd   :  { %v407_v48 = vadd.f32 %v4053_v15, %v406_v47  ;;  %3388 = vmatprep.mubr.msk.f32.mxu1 %vm764_vm1, %v691_v44  ;;  %v694_v51 = vmax.f32 %v412_v46, 0.0 }
  0xde   :  { %v3284_v49 = vpop.f32.mrf.mxu0  ;;  %3389 = vmatmul.mubr.msk.f32.gmra.mxu1 %vm764_vm1, %v692_v45 }
  0xdf   :  { %v693_v50 = vmax.f32 %v407_v48, 0.0  ;;  %v422_v52 = vadd.f32 %v3284_v49, %v4053_v15 }
  0xe0   :  { %v416_v53 = vpop.f32.mrf.mxu0 }
  0xe1   :  { %v417_v54 = vadd.f32 %v4053_v15, %v416_v53  ;;  %3391 = vmatprep.mubr.msk.f32.mxu1 %vm764_vm1, %v693_v50  ;;  %v696_v57 = vmax.f32 %v422_v52, 0.0 }
  0xe2   :  { %v3287_v55 = vpop.f32.mrf.mxu0  ;;  %3392 = vmatmul.mubr.msk.f32.gmra.mxu1 %vm764_vm1, %v694_v51 }
  0xe3   :  { %v695_v56 = vmax.f32 %v417_v54, 0.0  ;;  %v432_v58 = vadd.f32 %v3287_v55, %v4053_v15 }
  0xe4   :  { %v426_v59 = vpop.f32.mrf.mxu0 }
  0xe5   :  { %v427_v60 = vadd.f32 %v4053_v15, %v426_v59  ;;  %3394 = vmatprep.mubr.msk.f32.mxu1 %vm764_vm1, %v695_v56  ;;  %v698_v63 = vmax.f32 %v432_v58, 0.0 }
  0xe6   :  { %v3290_v61 = vpop.f32.mrf.mxu0  ;;  %3395 = vmatmul.mubr.msk.f32.gmra.mxu1 %vm764_vm1, %v696_v57 }
  0xe7   :  { %v697_v62 = vmax.f32 %v427_v60, 0.0  ;;  %v442_v0 = vadd.f32 %v3290_v61, %v4053_v15 }
  0xe8   :  { %v436_v1 = vpop.f32.mrf.mxu0 }
  0xe9   :  { %v437_v2 = vadd.f32 %v4053_v15, %v436_v1  ;;  %3397 = vmatprep.mubr.msk.f32.mxu1 %vm764_vm1, %v697_v62  ;;  %v700_v5 = vmax.f32 %v442_v0, 0.0 }
  0xea   :  { %v3293_v3 = vpop.f32.mrf.mxu0  ;;  %3398 = vmatmul.mubr.msk.f32.gmra.mxu1 %vm764_vm1, %v698_v63 }
  0xeb   :  { %v699_v4 = vmax.f32 %v437_v2, 0.0  ;;  %v452_v6 = vadd.f32 %v3293_v3, %v4053_v15 }
  0xec   :  { %v446_v7 = vpop.f32.mrf.mxu0 }
  0xed   :  { %v447_v8 = vadd.f32 %v4053_v15, %v446_v7  ;;  %3400 = vmatprep.mubr.msk.f32.mxu1 %vm764_vm1, %v699_v4  ;;  %v702_v11 = vmax.f32 %v452_v6, 0.0 }
  0xee   :  { %v3296_v9 = vpop.f32.mrf.mxu0  ;;  %3401 = vmatmul.mubr.msk.f32.gmra.mxu1 %vm764_vm1, %v700_v5 }
  0xef   :  { %v701_v10 = vmax.f32 %v447_v8, 0.0  ;;  %v462_v12 = vadd.f32 %v3296_v9, %v4053_v15 }
  0xf0   :  { %v456_v13 = vpop.f32.mrf.mxu0 }
  0xf1   :  { %v457_v14 = vadd.f32 %v4053_v15, %v456_v13  ;;  %3403 = vmatprep.mubr.msk.f32.mxu1 %vm764_vm1, %v701_v10  ;;  %v704_v18 = vmax.f32 %v462_v12, 0.0 }
  0xf2   :  { %v3299_v16 = vpop.f32.mrf.mxu0  ;;  %3404 = vmatmul.mubr.msk.f32.gmra.mxu1 %vm764_vm1, %v702_v11 }
  0xf3   :  { %v703_v17 = vmax.f32 %v457_v14, 0.0  ;;  %v472_v19 = vadd.f32 %v3299_v16, %v4053_v15 }
  0xf4   :  { %v466_v20 = vpop.f32.mrf.mxu0 }
  0xf5   :  { %v467_v21 = vadd.f32 %v4053_v15, %v466_v20  ;;  %3406 = vmatprep.mubr.msk.f32.mxu1 %vm764_vm1, %v703_v17  ;;  %v706_v24 = vmax.f32 %v472_v19, 0.0 }
  0xf6   :  { %v3302_v22 = vpop.f32.mrf.mxu0  ;;  %3407 = vmatmul.mubr.msk.f32.gmra.mxu1 %vm764_vm1, %v704_v18 }
  0xf7   :  { %v705_v23 = vmax.f32 %v467_v21, 0.0  ;;  %v482_v25 = vadd.f32 %v3302_v22, %v4053_v15 }
  0xf8   :  { %v476_v26 = vpop.f32.mrf.mxu0 }
  0xf9   :  { %v477_v27 = vadd.f32 %v4053_v15, %v476_v26  ;;  %3409 = vmatprep.mubr.msk.f32.mxu1 %vm764_vm1, %v705_v23  ;;  %v708_v30 = vmax.f32 %v482_v25, 0.0 }
  0xfa   :  { %v3305_v28 = vpop.f32.mrf.mxu0  ;;  %3410 = vmatmul.mubr.msk.f32.gmra.mxu1 %vm764_vm1, %v706_v24 }
  0xfb   :  { %v707_v29 = vmax.f32 %v477_v27, 0.0  ;;  %v492_v31 = vadd.f32 %v3305_v28, %v4053_v15 }
  0xfc   :  { %v486_v32 = vpop.f32.mrf.mxu0 }
  0xfd   :  { %v487_v33 = vadd.f32 %v4053_v15, %v486_v32  ;;  %3412 = vmatprep.mubr.msk.f32.mxu1 %vm764_vm1, %v707_v29  ;;  %v710_v36 = vmax.f32 %v492_v31, 0.0 }
  0xfe   :  { %v3308_v34 = vpop.f32.mrf.mxu0  ;;  %3413 = vmatmul.mubr.msk.f32.gmra.mxu1 %vm764_vm1, %v708_v30 }
  0xff   :  { %v709_v35 = vmax.f32 %v487_v33, 0.0  ;;  %v502_v37 = vadd.f32 %v3308_v34, %v4053_v15 }
 0x100   :  { %v496_v38 = vpop.f32.mrf.mxu0 }
 0x101   :  { %v497_v39 = vadd.f32 %v4053_v15, %v496_v38  ;;  %3415 = vmatprep.mubr.msk.f32.mxu1 %vm764_vm1, %v709_v35  ;;  %v712_v42 = vmax.f32 %v502_v37, 0.0 }
 0x102   :  { %v3311_v40 = vpop.f32.mrf.mxu0  ;;  %3416 = vmatmul.mubr.msk.f32.gmra.mxu1 %vm764_vm1, %v710_v36 }
 0x103   :  { %v711_v41 = vmax.f32 %v497_v39, 0.0  ;;  %v512_v43 = vadd.f32 %v3311_v40, %v4053_v15 }
 0x104   :  { %v506_v44 = vpop.f32.mrf.mxu0 }
 0x105   :  { %v507_v45 = vadd.f32 %v4053_v15, %v506_v44  ;;  %3418 = vmatprep.mubr.msk.f32.mxu1 %vm764_vm1, %v711_v41  ;;  %v714_v48 = vmax.f32 %v512_v43, 0.0 }
 0x106   :  { %v3314_v46 = vpop.f32.mrf.mxu0  ;;  %3419 = vmatmul.mubr.msk.f32.gmra.mxu1 %vm764_vm1, %v712_v42 }
 0x107   :  { %v713_v47 = vmax.f32 %v507_v45, 0.0  ;;  %v522_v49 = vadd.f32 %v3314_v46, %v4053_v15 }
 0x108   :  { %v516_v50 = vpop.f32.mrf.mxu0 }
 0x109   :  { %v517_v51 = vadd.f32 %v4053_v15, %v516_v50  ;;  %3421 = vmatprep.mubr.msk.f32.mxu1 %vm764_vm1, %v713_v47  ;;  %v716_v54 = vmax.f32 %v522_v49, 0.0 }
 0x10a   :  { %v3317_v52 = vpop.f32.mrf.mxu0  ;;  %3422 = vmatmul.mubr.msk.f32.gmra.mxu1 %vm764_vm1, %v714_v48 }
 0x10b   :  { %v715_v53 = vmax.f32 %v517_v51, 0.0  ;;  %v532_v55 = vadd.f32 %v3317_v52, %v4053_v15 }
 0x10c   :  { %v526_v56 = vpop.f32.mrf.mxu0 }
 0x10d   :  { %v527_v57 = vadd.f32 %v4053_v15, %v526_v56  ;;  %3424 = vmatprep.mubr.msk.f32.mxu1 %vm764_vm1, %v715_v53  ;;  %v718_v60 = vmax.f32 %v532_v55, 0.0 }
 0x10e   :  { %v3320_v58 = vpop.f32.mrf.mxu0  ;;  %3425 = vmatmul.mubr.msk.f32.gmra.mxu1 %vm764_vm1, %v716_v54 }
 0x10f   :  { %v717_v59 = vmax.f32 %v527_v57, 0.0  ;;  %v542_v61 = vadd.f32 %v3320_v58, %v4053_v15 }
 0x110   :  { %v536_v62 = vpop.f32.mrf.mxu0 }
 0x111   :  { %v537_v63 = vadd.f32 %v4053_v15, %v536_v62  ;;  %3427 = vmatprep.mubr.msk.f32.mxu1 %vm764_vm1, %v717_v59  ;;  %v720_v2 = vmax.f32 %v542_v61, 0.0 }
 0x112   :  { %v3323_v0 = vpop.f32.mrf.mxu0  ;;  %3428 = vmatmul.mubr.msk.f32.gmra.mxu1 %vm764_vm1, %v718_v60 }
 0x113   :  { %v719_v1 = vmax.f32 %v537_v63, 0.0  ;;  %v552_v3 = vadd.f32 %v3323_v0, %v4053_v15 }
 0x114   :  { %v546_v4 = vpop.f32.mrf.mxu0 }
 0x115   :  { %v547_v5 = vadd.f32 %v4053_v15, %v546_v4  ;;  %3430 = vmatprep.mubr.msk.f32.mxu1 %vm764_vm1, %v719_v1  ;;  %v722_v8 = vmax.f32 %v552_v3, 0.0 }
 0x116   :  { %v3326_v6 = vpop.f32.mrf.mxu0  ;;  %3431 = vmatmul.mubr.msk.f32.gmra.mxu1 %vm764_vm1, %v720_v2 }
 0x117   :  { %v721_v7 = vmax.f32 %v547_v5, 0.0  ;;  %v562_v9 = vadd.f32 %v3326_v6, %v4053_v15 }
 0x118   :  { %v556_v10 = vpop.f32.mrf.mxu0 }
 0x119   :  { %v557_v11 = vadd.f32 %v4053_v15, %v556_v10  ;;  %3433 = vmatprep.mubr.msk.f32.mxu1 %vm764_vm1, %v721_v7  ;;  %v724_v14 = vmax.f32 %v562_v9, 0.0 }
 0x11a   :  { %v3329_v12 = vpop.f32.mrf.mxu0  ;;  %3434 = vmatmul.mubr.msk.f32.gmra.mxu1 %vm764_vm1, %v722_v8 }
 0x11b   :  { %v723_v13 = vmax.f32 %v557_v11, 0.0  ;;  %v572_v16 = vadd.f32 %v3329_v12, %v4053_v15 }
 0x11c   :  { %v566_v17 = vpop.f32.mrf.mxu0 }
 0x11d   :  { %v567_v18 = vadd.f32 %v4053_v15, %v566_v17  ;;  %3436 = vmatprep.mubr.msk.f32.mxu1 %vm764_vm1, %v723_v13  ;;  %v726_v21 = vmax.f32 %v572_v16, 0.0 }
 0x11e   :  { %v3332_v19 = vpop.f32.mrf.mxu0  ;;  %3437 = vmatmul.mubr.msk.f32.gmra.mxu1 %vm764_vm1, %v724_v14 }
 0x11f   :  { %v725_v20 = vmax.f32 %v567_v18, 0.0  ;;  %v582_v22 = vadd.f32 %v3332_v19, %v4053_v15 }
 0x120   :  { %v576_v23 = vpop.f32.mrf.mxu0 }
 0x121   :  { %v577_v24 = vadd.f32 %v4053_v15, %v576_v23  ;;  %3439 = vmatprep.mubr.msk.f32.mxu1 %vm764_vm1, %v725_v20  ;;  %v728_v27 = vmax.f32 %v582_v22, 0.0 }
 0x122   :  { %v3335_v25 = vpop.f32.mrf.mxu0  ;;  %3440 = vmatmul.mubr.msk.f32.gmra.mxu1 %vm764_vm1, %v726_v21 }
 0x123   :  { %v727_v26 = vmax.f32 %v577_v24, 0.0  ;;  %v592_v28 = vadd.f32 %v3335_v25, %v4053_v15  ;;  %v2065_v24 = vld [vmem:[%s4806_s4 + $0x18] sm:$0xff]  ;;  %v4207_v25 = vld [vmem:[%s4807_s6] ss:$0 sm:$0xff] }
 0x124   :  { %v586_v29 = vpop.f32.mrf.mxu0  ;;  %3691 = vmatprep.subr.mxu1 %v2065_v24  ;;  %3587 = vmatprep.subr.mxu0 %v2065_v24 }
 0x125   :  { %v587_v30 = vadd.f32 %v4053_v15, %v586_v29  ;;  %3442 = vmatprep.mubr.msk.f32.mxu1 %vm764_vm1, %v727_v26  ;;  %v730_v33 = vmax.f32 %v592_v28, 0.0  ;;  %3695 = vmatpush3.msra.mxu1 %v2065_v24 }
 0x126   :  { %v3338_v31 = vpop.f32.mrf.mxu0  ;;  %3443 = vmatmul.mubr.msk.f32.gmra.mxu1 %vm764_vm1, %v728_v27 }
 0x127   :  { %v729_v32 = vmax.f32 %v587_v30, 0.0  ;;  %v602_v34 = vadd.f32 %v3338_v31, %v4053_v15  ;;  %v2063_v31 = vld [vmem:[%s4806_s4 + $0x8] sm:$0xff] }
 0x128   :  { %v596_v35 = vpop.f32.mrf.mxu0 }
 0x129   :  { %v597_v36 = vadd.f32 %v4053_v15, %v596_v35  ;;  %3445 = vmatprep.mubr.msk.f32.mxu1 %vm764_vm1, %v729_v32  ;;  %v732_v39 = vmax.f32 %v602_v34, 0.0 }
 0x12a   :  { %v3341_v37 = vpop.f32.mrf.mxu0  ;;  %3446 = vmatmul.mubr.msk.f32.gmra.mxu1 %vm764_vm1, %v730_v33 }
 0x12b   :  { %v731_v38 = vmax.f32 %v597_v36, 0.0  ;;  %v612_v40 = vadd.f32 %v3341_v37, %v4053_v15  ;;  %v2062_v36 = vld [vmem:[%s4806_s4] sm:$0xff] }
 0x12c   :  { %v606_v41 = vpop.f32.mrf.mxu0 }
 0x12d   :  { %v607_v42 = vadd.f32 %v4053_v15, %v606_v41  ;;  %3448 = vmatprep.mubr.msk.f32.mxu1 %vm764_vm1, %v731_v38  ;;  %v734_v45 = vmax.f32 %v612_v40, 0.0 }
 0x12e   :  { %v3344_v43 = vpop.f32.mrf.mxu0  ;;  %3449 = vmatmul.mubr.msk.f32.gmra.mxu1 %vm764_vm1, %v732_v39 }
 0x12f   :  { %v733_v44 = vmax.f32 %v607_v42, 0.0  ;;  %v622_v46 = vadd.f32 %v3344_v43, %v4053_v15 }
 0x130   :  { %v616_v47 = vpop.f32.mrf.mxu0 }
 0x131   :  { %v617_v48 = vadd.f32 %v4053_v15, %v616_v47  ;;  %3451 = vmatprep.mubr.msk.f32.mxu1 %vm764_vm1, %v733_v44  ;;  %v736_v51 = vmax.f32 %v622_v46, 0.0 }
 0x132   :  { %v3347_v49 = vpop.f32.mrf.mxu0  ;;  %3452 = vmatmul.mubr.msk.f32.gmra.mxu1 %vm764_vm1, %v734_v45 }
 0x133   :  { %v735_v50 = vmax.f32 %v617_v48, 0.0  ;;  %v632_v52 = vadd.f32 %v3347_v49, %v4053_v15 }
 0x134   :  { %v626_v53 = vpop.f32.mrf.mxu0 }
 0x135   :  { %v627_v54 = vadd.f32 %v4053_v15, %v626_v53  ;;  %3454 = vmatprep.mubr.msk.f32.mxu1 %vm764_vm1, %v735_v50  ;;  %v738_v57 = vmax.f32 %v632_v52, 0.0 }
 0x136   :  { %v3350_v55 = vpop.f32.mrf.mxu0  ;;  %3455 = vmatmul.mubr.msk.f32.gmra.mxu1 %vm764_vm1, %v736_v51 }
 0x137   :  { %v737_v56 = vmax.f32 %v627_v54, 0.0  ;;  %v642_v58 = vadd.f32 %v3350_v55, %v4053_v15 }
 0x138   :  { %v636_v59 = vpop.f32.mrf.mxu0 }
 0x139   :  { %v637_v60 = vadd.f32 %v4053_v15, %v636_v59  ;;  %3457 = vmatprep.mubr.msk.f32.mxu1 %vm764_vm1, %v737_v56  ;;  %v740_v63 = vmax.f32 %v642_v58, 0.0 }
 0x13a   :  { %v3353_v61 = vpop.f32.mrf.mxu0  ;;  %3458 = vmatmul.mubr.msk.f32.gmra.mxu1 %vm764_vm1, %v738_v57 }
 0x13b   :  { %v739_v62 = vmax.f32 %v637_v60, 0.0  ;;  %v652_v0 = vadd.f32 %v3353_v61, %v4053_v15 }
 0x13c   :  { %v646_v1 = vpop.f32.mrf.mxu0 }
 0x13d   :  { %v647_v2 = vadd.f32 %v4053_v15, %v646_v1  ;;  %3460 = vmatprep.mubr.msk.f32.mxu1 %vm764_vm1, %v739_v62  ;;  %v742_v5 = vmax.f32 %v652_v0, 0.0 }
 0x13e   :  { %v3356_v3 = vpop.f32.mrf.mxu0  ;;  %3461 = vmatmul.mubr.msk.f32.gmra.mxu1 %vm764_vm1, %v740_v63 }
 0x13f   :  { %v741_v4 = vmax.f32 %v647_v2, 0.0  ;;  %v662_v6 = vadd.f32 %v3356_v3, %v4053_v15 }
 0x140   :  { %v656_v7 = vpop.f32.mrf.mxu0 }
 0x141   :  { %v657_v8 = vadd.f32 %v4053_v15, %v656_v7  ;;  %3463 = vmatprep.mubr.msk.f32.mxu1 %vm764_vm1, %v741_v4  ;;  %v744_v11 = vmax.f32 %v662_v6, 0.0 }
 0x142   :  { %v3359_v9 = vpop.f32.mrf.mxu0  ;;  %3464 = vmatmul.mubr.msk.f32.gmra.mxu1 %vm764_vm1, %v742_v5 }
 0x143   :  { %v743_v10 = vmax.f32 %v657_v8, 0.0  ;;  %v672_v12 = vadd.f32 %v3359_v9, %v4053_v15 }
 0x144   :  { %v666_v13 = vpop.f32.mrf.mxu0 }
 0x145   :  { %v667_v14 = vadd.f32 %v4053_v15, %v666_v13  ;;  %3466 = vmatprep.mubr.msk.f32.mxu1 %vm764_vm1, %v743_v10  ;;  %v746_v18 = vmax.f32 %v672_v12, 0.0 }
 0x146   :  { %v3362_v16 = vpop.f32.mrf.mxu0  ;;  %3467 = vmatmul.mubr.msk.f32.gmra.mxu1 %vm764_vm1, %v744_v11 }
 0x147   :  { %v745_v17 = vmax.f32 %v667_v14, 0.0  ;;  %v682_v19 = vadd.f32 %v3362_v16, %v4053_v15 }
 0x148   :  { %v676_v20 = vpop.f32.mrf.mxu0 }
 0x149   :  { %v677_v21 = vadd.f32 %v4053_v15, %v676_v20  ;;  %3469 = vmatprep.mubr.msk.f32.mxu1 %vm764_vm1, %v745_v17  ;;  %v748_v23 = vmax.f32 %v682_v19, 0.0  ;;  %v2064_v15 = vld [vmem:[%s4806_s4 + $0x10] sm:$0xff] }
 0x14a   :  { %3470 = vmatmul.mubr.msk.f32.gmra.mxu1 %vm764_vm1, %v746_v18  ;;  %3692 = vmatprep.subr.mxu1 %v2064_v15 }
 0x14b   :  { %v747_v22 = vmax.f32 %v677_v21, 0.0  ;;  %3696 = vmatpush3.msra.mxu1 %v2064_v15 }
 0x14c   :  { %3693 = vmatprep.subr.mxu1 %v2063_v31 }
 0x14d   :  { %3472 = vmatprep.mubr.msk.f32.mxu1 %vm764_vm1, %v747_v22  ;;  %3697 = vmatpush3.msra.mxu1 %v2063_v31 }
 0x14e   :  { %3473 = vmatmul.mubr.msk.f32.gmra.mxu1 %vm764_vm1, %v748_v23  ;;  %3694 = vmatprep.subr.mxu1 %v2062_v36 }
 0x14f   :  { %3698 = vmatpush3.msra.mxu1 %v2062_v36 }
 0x192   :  { %v3381_v26 = vpop.f32.mrf.mxu1 }
 0x193   :  { %v1029_v27 = vadd.f32 %v3381_v26, %v4207_v25 }
 0x194   :  { %v1023_v28 = vpop.f32.mrf.mxu1 }
 0x195   :  { %v1024_v29 = vadd.f32 %v4207_v25, %v1023_v28  ;;  %v1343_v33 = vmax.f32 %v1029_v27, 0.0 }
 0x196   :  { %v3384_v30 = vpop.f32.mrf.mxu1 }
 0x197   :  { %v1342_v32 = vmax.f32 %v1024_v29, 0.0  ;;  %v1039_v34 = vadd.f32 %v3384_v30, %v4207_v25 }
 0x198   :  { %v1033_v35 = vpop.f32.mrf.mxu1 }
 0x199   :  { %v1034_v37 = vadd.f32 %v4207_v25, %v1033_v35  ;;  %3491 = vmatprep.mubr.msk.f32.mxu0 %vm764_vm1, %v1342_v32  ;;  %v1345_v40 = vmax.f32 %v1039_v34, 0.0 }
 0x19a   :  { %v3387_v38 = vpop.f32.mrf.mxu1  ;;  %3492 = vmatmul.mubr.msk.f32.vlgmr.msra.gmra.mxu0 %vm764_vm1, %v1343_v33 }
 0x19b   :  { %v1344_v39 = vmax.f32 %v1034_v37, 0.0  ;;  %3588 = vmatpush3.msra.mxu0 %v2065_v24  ;;  %v1049_v41 = vadd.f32 %v3387_v38, %v4207_v25 }
 0x19c   :  { %v1043_v42 = vpop.f32.mrf.mxu1  ;;  %3589 = vmatprep.subr.mxu0 %v2064_v15 }
 0x19d   :  { %v1044_v43 = vadd.f32 %v4207_v25, %v1043_v42  ;;  %3494 = vmatprep.mubr.msk.f32.mxu0 %vm764_vm1, %v1344_v39  ;;  %3590 = vmatpush3.msra.mxu0 %v2064_v15  ;;  %v1347_v46 = vmax.f32 %v1049_v41, 0.0 }
 0x19e   :  { %v3390_v44 = vpop.f32.mrf.mxu1  ;;  %3495 = vmatmul.mubr.msk.f32.gmra.mxu0 %vm764_vm1, %v1345_v40  ;;  %3591 = vmatprep.subr.mxu0 %v2063_v31 }
 0x19f   :  { %v1346_v45 = vmax.f32 %v1044_v43, 0.0  ;;  %3592 = vmatpush3.msra.mxu0 %v2063_v31  ;;  %v1059_v47 = vadd.f32 %v3390_v44, %v4207_v25 }
 0x1a0   :  { %v1053_v48 = vpop.f32.mrf.mxu1  ;;  %3593 = vmatprep.subr.mxu0 %v2062_v36 }
 0x1a1   :  { %v1054_v49 = vadd.f32 %v4207_v25, %v1053_v48  ;;  %3497 = vmatprep.mubr.msk.f32.mxu0 %vm764_vm1, %v1346_v45  ;;  %3594 = vmatpush3.msra.mxu0 %v2062_v36  ;;  %v1349_v52 = vmax.f32 %v1059_v47, 0.0 }
 0x1a2   :  { %v3393_v50 = vpop.f32.mrf.mxu1  ;;  %3498 = vmatmul.mubr.msk.f32.gmra.mxu0 %vm764_vm1, %v1347_v46 }
 0x1a3   :  { %v1348_v51 = vmax.f32 %v1054_v49, 0.0  ;;  %v1069_v53 = vadd.f32 %v3393_v50, %v4207_v25 }
 0x1a4   :  { %v1063_v54 = vpop.f32.mrf.mxu1 }
 0x1a5   :  { %v1064_v55 = vadd.f32 %v4207_v25, %v1063_v54  ;;  %3500 = vmatprep.mubr.msk.f32.mxu0 %vm764_vm1, %v1348_v51  ;;  %v1351_v58 = vmax.f32 %v1069_v53, 0.0 }
 0x1a6   :  { %v3396_v56 = vpop.f32.mrf.mxu1  ;;  %3501 = vmatmul.mubr.msk.f32.gmra.mxu0 %vm764_vm1, %v1349_v52 }
 0x1a7   :  { %v1350_v57 = vmax.f32 %v1064_v55, 0.0  ;;  %v1079_v59 = vadd.f32 %v3396_v56, %v4207_v25 }
 0x1a8   :  { %v1073_v60 = vpop.f32.mrf.mxu1 }
 0x1a9   :  { %v1074_v61 = vadd.f32 %v4207_v25, %v1073_v60  ;;  %3503 = vmatprep.mubr.msk.f32.mxu0 %vm764_vm1, %v1350_v57  ;;  %v1353_v0 = vmax.f32 %v1079_v59, 0.0 }
 0x1aa   :  { %v3399_v62 = vpop.f32.mrf.mxu1  ;;  %3504 = vmatmul.mubr.msk.f32.gmra.mxu0 %vm764_vm1, %v1351_v58 }
 0x1ab   :  { %v1352_v63 = vmax.f32 %v1074_v61, 0.0  ;;  %v1089_v1 = vadd.f32 %v3399_v62, %v4207_v25 }
 0x1ac   :  { %v1083_v2 = vpop.f32.mrf.mxu1 }
 0x1ad   :  { %v1084_v3 = vadd.f32 %v4207_v25, %v1083_v2  ;;  %3506 = vmatprep.mubr.msk.f32.mxu0 %vm764_vm1, %v1352_v63  ;;  %v1355_v6 = vmax.f32 %v1089_v1, 0.0 }
 0x1ae   :  { %v3402_v4 = vpop.f32.mrf.mxu1  ;;  %3507 = vmatmul.mubr.msk.f32.gmra.mxu0 %vm764_vm1, %v1353_v0 }
 0x1af   :  { %v1354_v5 = vmax.f32 %v1084_v3, 0.0  ;;  %v1099_v7 = vadd.f32 %v3402_v4, %v4207_v25 }
 0x1b0   :  { %v1093_v8 = vpop.f32.mrf.mxu1 }
 0x1b1   :  { %v1094_v9 = vadd.f32 %v4207_v25, %v1093_v8  ;;  %3509 = vmatprep.mubr.msk.f32.mxu0 %vm764_vm1, %v1354_v5  ;;  %v1357_v12 = vmax.f32 %v1099_v7, 0.0 }
 0x1b2   :  { %v3405_v10 = vpop.f32.mrf.mxu1  ;;  %3510 = vmatmul.mubr.msk.f32.gmra.mxu0 %vm764_vm1, %v1355_v6 }
 0x1b3   :  { %v1356_v11 = vmax.f32 %v1094_v9, 0.0  ;;  %v1109_v13 = vadd.f32 %v3405_v10, %v4207_v25 }
 0x1b4   :  { %v1103_v14 = vpop.f32.mrf.mxu1 }
 0x1b5   :  { %v1104_v16 = vadd.f32 %v4207_v25, %v1103_v14  ;;  %3512 = vmatprep.mubr.msk.f32.mxu0 %vm764_vm1, %v1356_v11  ;;  %v1359_v19 = vmax.f32 %v1109_v13, 0.0 }
 0x1b6   :  { %v3408_v17 = vpop.f32.mrf.mxu1  ;;  %3513 = vmatmul.mubr.msk.f32.gmra.mxu0 %vm764_vm1, %v1357_v12 }
 0x1b7   :  { %v1358_v18 = vmax.f32 %v1104_v16, 0.0  ;;  %v1119_v20 = vadd.f32 %v3408_v17, %v4207_v25 }
 0x1b8   :  { %v1113_v21 = vpop.f32.mrf.mxu1 }
 0x1b9   :  { %v1114_v22 = vadd.f32 %v4207_v25, %v1113_v21  ;;  %3515 = vmatprep.mubr.msk.f32.mxu0 %vm764_vm1, %v1358_v18  ;;  %v1361_v15 = vmax.f32 %v1119_v20, 0.0 }
 0x1ba   :  { %v3411_v23 = vpop.f32.mrf.mxu1  ;;  %3516 = vmatmul.mubr.msk.f32.gmra.mxu0 %vm764_vm1, %v1359_v19 }
 0x1bb   :  { %v1360_v24 = vmax.f32 %v1114_v22, 0.0  ;;  %v1129_v26 = vadd.f32 %v3411_v23, %v4207_v25 }
 0x1bc   :  { %v1123_v27 = vpop.f32.mrf.mxu1 }
 0x1bd   :  { %v1124_v28 = vadd.f32 %v4207_v25, %v1123_v27  ;;  %3518 = vmatprep.mubr.msk.f32.mxu0 %vm764_vm1, %v1360_v24  ;;  %v1363_v31 = vmax.f32 %v1129_v26, 0.0 }
 0x1be   :  { %v3414_v29 = vpop.f32.mrf.mxu1  ;;  %3519 = vmatmul.mubr.msk.f32.gmra.mxu0 %vm764_vm1, %v1361_v15 }
 0x1bf   :  { %v1362_v30 = vmax.f32 %v1124_v28, 0.0  ;;  %v1139_v32 = vadd.f32 %v3414_v29, %v4207_v25 }
 0x1c0   :  { %v1133_v33 = vpop.f32.mrf.mxu1 }
 0x1c1   :  { %v1134_v34 = vadd.f32 %v4207_v25, %v1133_v33  ;;  %3521 = vmatprep.mubr.msk.f32.mxu0 %vm764_vm1, %v1362_v30  ;;  %v1365_v37 = vmax.f32 %v1139_v32, 0.0 }
 0x1c2   :  { %v3417_v35 = vpop.f32.mrf.mxu1  ;;  %3522 = vmatmul.mubr.msk.f32.gmra.mxu0 %vm764_vm1, %v1363_v31 }
 0x1c3   :  { %v1364_v36 = vmax.f32 %v1134_v34, 0.0  ;;  %v1149_v38 = vadd.f32 %v3417_v35, %v4207_v25 }
 0x1c4   :  { %v1143_v39 = vpop.f32.mrf.mxu1 }
 0x1c5   :  { %v1144_v40 = vadd.f32 %v4207_v25, %v1143_v39  ;;  %3524 = vmatprep.mubr.msk.f32.mxu0 %vm764_vm1, %v1364_v36  ;;  %v1367_v43 = vmax.f32 %v1149_v38, 0.0 }
 0x1c6   :  { %v3420_v41 = vpop.f32.mrf.mxu1  ;;  %3525 = vmatmul.mubr.msk.f32.gmra.mxu0 %vm764_vm1, %v1365_v37 }
 0x1c7   :  { %v1366_v42 = vmax.f32 %v1144_v40, 0.0  ;;  %v1159_v44 = vadd.f32 %v3420_v41, %v4207_v25 }
 0x1c8   :  { %v1153_v45 = vpop.f32.mrf.mxu1 }
 0x1c9   :  { %v1154_v46 = vadd.f32 %v4207_v25, %v1153_v45  ;;  %3527 = vmatprep.mubr.msk.f32.mxu0 %vm764_vm1, %v1366_v42  ;;  %v1369_v49 = vmax.f32 %v1159_v44, 0.0 }
 0x1ca   :  { %v3423_v47 = vpop.f32.mrf.mxu1  ;;  %3528 = vmatmul.mubr.msk.f32.gmra.mxu0 %vm764_vm1, %v1367_v43 }
 0x1cb   :  { %v1368_v48 = vmax.f32 %v1154_v46, 0.0  ;;  %v1169_v50 = vadd.f32 %v3423_v47, %v4207_v25 }
 0x1cc   :  { %v1163_v51 = vpop.f32.mrf.mxu1 }
 0x1cd   :  { %v1164_v52 = vadd.f32 %v4207_v25, %v1163_v51  ;;  %3530 = vmatprep.mubr.msk.f32.mxu0 %vm764_vm1, %v1368_v48  ;;  %v1371_v55 = vmax.f32 %v1169_v50, 0.0 }
 0x1ce   :  { %v3426_v53 = vpop.f32.mrf.mxu1  ;;  %3531 = vmatmul.mubr.msk.f32.gmra.mxu0 %vm764_vm1, %v1369_v49 }
 0x1cf   :  { %v1370_v54 = vmax.f32 %v1164_v52, 0.0  ;;  %v1179_v56 = vadd.f32 %v3426_v53, %v4207_v25 }
 0x1d0   :  { %v1173_v57 = vpop.f32.mrf.mxu1 }
 0x1d1   :  { %v1174_v58 = vadd.f32 %v4207_v25, %v1173_v57  ;;  %3533 = vmatprep.mubr.msk.f32.mxu0 %vm764_vm1, %v1370_v54  ;;  %v1373_v61 = vmax.f32 %v1179_v56, 0.0 }
 0x1d2   :  { %v3429_v59 = vpop.f32.mrf.mxu1  ;;  %3534 = vmatmul.mubr.msk.f32.gmra.mxu0 %vm764_vm1, %v1371_v55 }
 0x1d3   :  { %v1372_v60 = vmax.f32 %v1174_v58, 0.0  ;;  %v1189_v62 = vadd.f32 %v3429_v59, %v4207_v25 }
 0x1d4   :  { %v1183_v63 = vpop.f32.mrf.mxu1 }
 0x1d5   :  { %v1184_v0 = vadd.f32 %v4207_v25, %v1183_v63  ;;  %3536 = vmatprep.mubr.msk.f32.mxu0 %vm764_vm1, %v1372_v60  ;;  %v1375_v3 = vmax.f32 %v1189_v62, 0.0 }
 0x1d6   :  { %v3432_v1 = vpop.f32.mrf.mxu1  ;;  %3537 = vmatmul.mubr.msk.f32.gmra.mxu0 %vm764_vm1, %v1373_v61 }
 0x1d7   :  { %v1374_v2 = vmax.f32 %v1184_v0, 0.0  ;;  %v1199_v4 = vadd.f32 %v3432_v1, %v4207_v25 }
 0x1d8   :  { %v1193_v5 = vpop.f32.mrf.mxu1 }
 0x1d9   :  { %v1194_v6 = vadd.f32 %v4207_v25, %v1193_v5  ;;  %3539 = vmatprep.mubr.msk.f32.mxu0 %vm764_vm1, %v1374_v2  ;;  %v1377_v9 = vmax.f32 %v1199_v4, 0.0 }
 0x1da   :  { %v3435_v7 = vpop.f32.mrf.mxu1  ;;  %3540 = vmatmul.mubr.msk.f32.gmra.mxu0 %vm764_vm1, %v1375_v3 }
 0x1db   :  { %v1376_v8 = vmax.f32 %v1194_v6, 0.0  ;;  %v1209_v10 = vadd.f32 %v3435_v7, %v4207_v25 }
 0x1dc   :  { %v1203_v11 = vpop.f32.mrf.mxu1 }
 0x1dd   :  { %v1204_v12 = vadd.f32 %v4207_v25, %v1203_v11  ;;  %3542 = vmatprep.mubr.msk.f32.mxu0 %vm764_vm1, %v1376_v8  ;;  %v1379_v16 = vmax.f32 %v1209_v10, 0.0 }
 0x1de   :  { %v3438_v13 = vpop.f32.mrf.mxu1  ;;  %3543 = vmatmul.mubr.msk.f32.gmra.mxu0 %vm764_vm1, %v1377_v9 }
 0x1df   :  { %v1378_v14 = vmax.f32 %v1204_v12, 0.0  ;;  %v1219_v17 = vadd.f32 %v3438_v13, %v4207_v25 }
 0x1e0   :  { %v1213_v18 = vpop.f32.mrf.mxu1 }
 0x1e1   :  { %v1214_v19 = vadd.f32 %v4207_v25, %v1213_v18  ;;  %3545 = vmatprep.mubr.msk.f32.mxu0 %vm764_vm1, %v1378_v14  ;;  %v1381_v22 = vmax.f32 %v1219_v17, 0.0 }
 0x1e2   :  { %v3441_v20 = vpop.f32.mrf.mxu1  ;;  %3546 = vmatmul.mubr.msk.f32.gmra.mxu0 %vm764_vm1, %v1379_v16 }
 0x1e3   :  { %v1380_v21 = vmax.f32 %v1214_v19, 0.0  ;;  %v1229_v23 = vadd.f32 %v3441_v20, %v4207_v25 }
 0x1e4   :  { %v1223_v24 = vpop.f32.mrf.mxu1 }
 0x1e5   :  { %v1224_v15 = vadd.f32 %v4207_v25, %v1223_v24  ;;  %3548 = vmatprep.mubr.msk.f32.mxu0 %vm764_vm1, %v1380_v21  ;;  %v1383_v28 = vmax.f32 %v1229_v23, 0.0 }
 0x1e6   :  { %v3444_v26 = vpop.f32.mrf.mxu1  ;;  %3549 = vmatmul.mubr.msk.f32.gmra.mxu0 %vm764_vm1, %v1381_v22 }
 0x1e7   :  { %v1382_v27 = vmax.f32 %v1224_v15, 0.0  ;;  %v1239_v29 = vadd.f32 %v3444_v26, %v4207_v25 }
 0x1e8   :  { %v1233_v30 = vpop.f32.mrf.mxu1 }
 0x1e9   :  { %v1234_v31 = vadd.f32 %v4207_v25, %v1233_v30  ;;  %3551 = vmatprep.mubr.msk.f32.mxu0 %vm764_vm1, %v1382_v27  ;;  %v1385_v34 = vmax.f32 %v1239_v29, 0.0 }
 0x1ea   :  { %v3447_v32 = vpop.f32.mrf.mxu1  ;;  %3552 = vmatmul.mubr.msk.f32.gmra.mxu0 %vm764_vm1, %v1383_v28 }
 0x1eb   :  { %v1384_v33 = vmax.f32 %v1234_v31, 0.0  ;;  %v1249_v35 = vadd.f32 %v3447_v32, %v4207_v25  ;;  %v4346_v31 = vld [vmem:[%s4808_s7] ss:$0 sm:$0xff] }
 0x1ec   :  { %v1243_v36 = vpop.f32.mrf.mxu1 }
 0x1ed   :  { %v1244_v37 = vadd.f32 %v4207_v25, %v1243_v36  ;;  %3554 = vmatprep.mubr.msk.f32.mxu0 %vm764_vm1, %v1384_v33  ;;  %v1387_v40 = vmax.f32 %v1249_v35, 0.0 }
 0x1ee   :  { %v3450_v38 = vpop.f32.mrf.mxu1  ;;  %3555 = vmatmul.mubr.msk.f32.gmra.mxu0 %vm764_vm1, %v1385_v34 }
 0x1ef   :  { %v1386_v39 = vmax.f32 %v1244_v37, 0.0  ;;  %v1259_v41 = vadd.f32 %v3450_v38, %v4207_v25 }
 0x1f0   :  { %v1253_v42 = vpop.f32.mrf.mxu1 }
 0x1f1   :  { %v1254_v43 = vadd.f32 %v4207_v25, %v1253_v42  ;;  %3557 = vmatprep.mubr.msk.f32.mxu0 %vm764_vm1, %v1386_v39  ;;  %v1389_v46 = vmax.f32 %v1259_v41, 0.0 }
 0x1f2   :  { %v3453_v44 = vpop.f32.mrf.mxu1  ;;  %3558 = vmatmul.mubr.msk.f32.gmra.mxu0 %vm764_vm1, %v1387_v40 }
 0x1f3   :  { %v1388_v45 = vmax.f32 %v1254_v43, 0.0  ;;  %v1269_v47 = vadd.f32 %v3453_v44, %v4207_v25 }
 0x1f4   :  { %v1263_v48 = vpop.f32.mrf.mxu1 }
 0x1f5   :  { %v1264_v49 = vadd.f32 %v4207_v25, %v1263_v48  ;;  %3560 = vmatprep.mubr.msk.f32.mxu0 %vm764_vm1, %v1388_v45  ;;  %v1391_v52 = vmax.f32 %v1269_v47, 0.0 }
 0x1f6   :  { %v3456_v50 = vpop.f32.mrf.mxu1  ;;  %3561 = vmatmul.mubr.msk.f32.gmra.mxu0 %vm764_vm1, %v1389_v46 }
 0x1f7   :  { %v1390_v51 = vmax.f32 %v1264_v49, 0.0  ;;  %v1279_v53 = vadd.f32 %v3456_v50, %v4207_v25 }
 0x1f8   :  { %v1273_v54 = vpop.f32.mrf.mxu1 }
 0x1f9   :  { %v1274_v55 = vadd.f32 %v4207_v25, %v1273_v54  ;;  %3563 = vmatprep.mubr.msk.f32.mxu0 %vm764_vm1, %v1390_v51  ;;  %v1393_v58 = vmax.f32 %v1279_v53, 0.0 }
 0x1fa   :  { %v3459_v56 = vpop.f32.mrf.mxu1  ;;  %3564 = vmatmul.mubr.msk.f32.gmra.mxu0 %vm764_vm1, %v1391_v52 }
 0x1fb   :  { %v1392_v57 = vmax.f32 %v1274_v55, 0.0  ;;  %v1289_v59 = vadd.f32 %v3459_v56, %v4207_v25 }
 0x1fc   :  { %v1283_v60 = vpop.f32.mrf.mxu1 }
 0x1fd   :  { %v1284_v61 = vadd.f32 %v4207_v25, %v1283_v60  ;;  %3566 = vmatprep.mubr.msk.f32.mxu0 %vm764_vm1, %v1392_v57  ;;  %v1395_v0 = vmax.f32 %v1289_v59, 0.0 }
 0x1fe   :  { %v3462_v62 = vpop.f32.mrf.mxu1  ;;  %3567 = vmatmul.mubr.msk.f32.gmra.mxu0 %vm764_vm1, %v1393_v58 }
 0x1ff   :  { %v1394_v63 = vmax.f32 %v1284_v61, 0.0  ;;  %v1299_v1 = vadd.f32 %v3462_v62, %v4207_v25 }
 0x200   :  { %v1293_v2 = vpop.f32.mrf.mxu1 }
 0x201   :  { %v1294_v3 = vadd.f32 %v4207_v25, %v1293_v2  ;;  %3569 = vmatprep.mubr.msk.f32.mxu0 %vm764_vm1, %v1394_v63  ;;  %v1397_v6 = vmax.f32 %v1299_v1, 0.0 }
 0x202   :  { %v3465_v4 = vpop.f32.mrf.mxu1  ;;  %3570 = vmatmul.mubr.msk.f32.gmra.mxu0 %vm764_vm1, %v1395_v0 }
 0x203   :  { %v1396_v5 = vmax.f32 %v1294_v3, 0.0  ;;  %v1309_v7 = vadd.f32 %v3465_v4, %v4207_v25 }
 0x204   :  { %v1303_v8 = vpop.f32.mrf.mxu1 }
 0x205   :  { %v1304_v9 = vadd.f32 %v4207_v25, %v1303_v8  ;;  %3572 = vmatprep.mubr.msk.f32.mxu0 %vm764_vm1, %v1396_v5  ;;  %v1399_v12 = vmax.f32 %v1309_v7, 0.0 }
 0x206   :  { %v3468_v10 = vpop.f32.mrf.mxu1  ;;  %3573 = vmatmul.mubr.msk.f32.gmra.mxu0 %vm764_vm1, %v1397_v6 }
 0x207   :  { %v1398_v11 = vmax.f32 %v1304_v9, 0.0  ;;  %v1319_v13 = vadd.f32 %v3468_v10, %v4207_v25 }
 0x208   :  { %v1313_v14 = vpop.f32.mrf.mxu1 }
 0x209   :  { %v1314_v16 = vadd.f32 %v4207_v25, %v1313_v14  ;;  %3575 = vmatprep.mubr.msk.f32.mxu0 %vm764_vm1, %v1398_v11  ;;  %v1401_v19 = vmax.f32 %v1319_v13, 0.0 }
 0x20a   :  { %v3471_v17 = vpop.f32.mrf.mxu1  ;;  %3576 = vmatmul.mubr.msk.f32.gmra.mxu0 %vm764_vm1, %v1399_v12 }
 0x20b   :  { %v1400_v18 = vmax.f32 %v1314_v16, 0.0  ;;  %v1329_v20 = vadd.f32 %v3471_v17, %v4207_v25 }
 0x20c   :  { %v1323_v21 = vpop.f32.mrf.mxu1 }
 0x20d   :  { %v1324_v22 = vadd.f32 %v4207_v25, %v1323_v21  ;;  %3578 = vmatprep.mubr.msk.f32.mxu0 %vm764_vm1, %v1400_v18  ;;  %v1403_v15 = vmax.f32 %v1329_v20, 0.0 }
 0x20e   :  { %v3474_v23 = vpop.f32.mrf.mxu1  ;;  %3579 = vmatmul.mubr.msk.f32.gmra.mxu0 %vm764_vm1, %v1401_v19 }
 0x20f   :  { %v1402_v24 = vmax.f32 %v1324_v22, 0.0  ;;  %v1339_v26 = vadd.f32 %v3474_v23, %v4207_v25 }
 0x210   :  { %v1333_v27 = vpop.f32.mrf.mxu1 }
 0x211   :  { %v1334_v28 = vadd.f32 %v4207_v25, %v1333_v27  ;;  %3581 = vmatprep.mubr.msk.f32.mxu0 %vm764_vm1, %v1402_v24  ;;  %v1405_v30 = vmax.f32 %v1339_v26, 0.0 }
 0x212   :  { %3582 = vmatmul.mubr.msk.f32.gmra.mxu0 %vm764_vm1, %v1403_v15 }
 0x213   :  { %v1404_v29 = vmax.f32 %v1334_v28, 0.0 }
 0x215   :  { %3584 = vmatprep.mubr.msk.f32.mxu0 %vm764_vm1, %v1404_v29 }
 0x216   :  { %3585 = vmatmul.mubr.msk.f32.gmra.mxu0 %vm764_vm1, %v1405_v30 }
 0x25a   :  { %v3493_v32 = vpop.f32.mrf.mxu0 }
 0x25b   :  { %v1685_v33 = vadd.f32 %v3493_v32, %v4346_v31 }
 0x25c   :  { %v1679_v34 = vpop.f32.mrf.mxu0 }
 0x25d   :  { %v1680_v25 = vadd.f32 %v4346_v31, %v1679_v34  ;;  %v1999_v37 = vmax.f32 %v1685_v33, 0.0 }
 0x25e   :  { %v3496_v35 = vpop.f32.mrf.mxu0 }
 0x25f   :  { %v1998_v36 = vmax.f32 %v1680_v25, 0.0  ;;  %v1695_v38 = vadd.f32 %v3496_v35, %v4346_v31 }
 0x260   :  { %v1689_v39 = vpop.f32.mrf.mxu0 }
 0x261   :  { %v1690_v40 = vadd.f32 %v4346_v31, %v1689_v39  ;;  %3595 = vmatprep.mubr.msk.f32.mxu0 %vm107_vm0, %v1998_v36  ;;  %v2001_v43 = vmax.f32 %v1695_v38, 0.0 }
 0x262   :  { %v3499_v41 = vpop.f32.mrf.mxu0  ;;  %3596 = vmatmul.mubr.msk.f32.vlgmr.msra.gmra.mxu0 %vm107_vm0, %v1999_v37 }
 0x263   :  { %v2000_v42 = vmax.f32 %v1690_v40, 0.0  ;;  %v1705_v44 = vadd.f32 %v3499_v41, %v4346_v31 }
 0x264   :  { %v1699_v45 = vpop.f32.mrf.mxu0 }
 0x265   :  { %v1700_v46 = vadd.f32 %v4346_v31, %v1699_v45  ;;  %3598 = vmatprep.mubr.msk.f32.mxu1 %vm107_vm0, %v2000_v42  ;;  %v2003_v49 = vmax.f32 %v1705_v44, 0.0 }
 0x266   :  { %v3502_v47 = vpop.f32.mrf.mxu0  ;;  %3599 = vmatmul.mubr.msk.f32.vlgmr.msra.gmra.mxu1 %vm107_vm0, %v2001_v43 }
 0x267   :  { %v2002_v48 = vmax.f32 %v1700_v46, 0.0  ;;  %v1715_v50 = vadd.f32 %v3502_v47, %v4346_v31 }
 0x268   :  { %v1709_v51 = vpop.f32.mrf.mxu0 }
 0x269   :  { %v1710_v52 = vadd.f32 %v4346_v31, %v1709_v51  ;;  %3601 = vmatprep.mubr.msk.f32.mxu1 %vm107_vm0, %v2002_v48  ;;  %v2005_v55 = vmax.f32 %v1715_v50, 0.0 }
 0x26a   :  { %v3505_v53 = vpop.f32.mrf.mxu0  ;;  %3602 = vmatmul.mubr.msk.f32.gmra.mxu1 %vm107_vm0, %v2003_v49 }
 0x26b   :  { %v2004_v54 = vmax.f32 %v1710_v52, 0.0  ;;  %v1725_v56 = vadd.f32 %v3505_v53, %v4346_v31 }
 0x26c   :  { %v1719_v57 = vpop.f32.mrf.mxu0 }
 0x26d   :  { %v1720_v58 = vadd.f32 %v4346_v31, %v1719_v57  ;;  %3604 = vmatprep.mubr.msk.f32.mxu1 %vm107_vm0, %v2004_v54  ;;  %v2007_v61 = vmax.f32 %v1725_v56, 0.0 }
 0x26e   :  { %v3508_v59 = vpop.f32.mrf.mxu0  ;;  %3605 = vmatmul.mubr.msk.f32.gmra.mxu1 %vm107_vm0, %v2005_v55 }
 0x26f   :  { %v2006_v60 = vmax.f32 %v1720_v58, 0.0  ;;  %v1735_v62 = vadd.f32 %v3508_v59, %v4346_v31 }
 0x270   :  { %v1729_v63 = vpop.f32.mrf.mxu0 }
 0x271   :  { %v1730_v0 = vadd.f32 %v4346_v31, %v1729_v63  ;;  %3607 = vmatprep.mubr.msk.f32.mxu1 %vm107_vm0, %v2006_v60  ;;  %v2009_v3 = vmax.f32 %v1735_v62, 0.0 }
 0x272   :  { %v3511_v1 = vpop.f32.mrf.mxu0  ;;  %3608 = vmatmul.mubr.msk.f32.gmra.mxu1 %vm107_vm0, %v2007_v61 }
 0x273   :  { %v2008_v2 = vmax.f32 %v1730_v0, 0.0  ;;  %v1745_v4 = vadd.f32 %v3511_v1, %v4346_v31 }
 0x274   :  { %v1739_v5 = vpop.f32.mrf.mxu0 }
 0x275   :  { %v1740_v6 = vadd.f32 %v4346_v31, %v1739_v5  ;;  %3610 = vmatprep.mubr.msk.f32.mxu1 %vm107_vm0, %v2008_v2  ;;  %v2011_v9 = vmax.f32 %v1745_v4, 0.0 }
 0x276   :  { %v3514_v7 = vpop.f32.mrf.mxu0  ;;  %3611 = vmatmul.mubr.msk.f32.gmra.mxu1 %vm107_vm0, %v2009_v3 }
 0x277   :  { %v2010_v8 = vmax.f32 %v1740_v6, 0.0  ;;  %v1755_v10 = vadd.f32 %v3514_v7, %v4346_v31 }
 0x278   :  { %v1749_v11 = vpop.f32.mrf.mxu0 }
 0x279   :  { %v1750_v12 = vadd.f32 %v4346_v31, %v1749_v11  ;;  %3613 = vmatprep.mubr.msk.f32.mxu1 %vm107_vm0, %v2010_v8  ;;  %v2013_v16 = vmax.f32 %v1755_v10, 0.0 }
 0x27a   :  { %v3517_v13 = vpop.f32.mrf.mxu0  ;;  %3614 = vmatmul.mubr.msk.f32.gmra.mxu1 %vm107_vm0, %v2011_v9 }
 0x27b   :  { %v2012_v14 = vmax.f32 %v1750_v12, 0.0  ;;  %v1765_v17 = vadd.f32 %v3517_v13, %v4346_v31 }
 0x27c   :  { %v1759_v18 = vpop.f32.mrf.mxu0 }
 0x27d   :  { %v1760_v19 = vadd.f32 %v4346_v31, %v1759_v18  ;;  %3616 = vmatprep.mubr.msk.f32.mxu1 %vm107_vm0, %v2012_v14  ;;  %v2015_v22 = vmax.f32 %v1765_v17, 0.0 }
 0x27e   :  { %v3520_v20 = vpop.f32.mrf.mxu0  ;;  %3617 = vmatmul.mubr.msk.f32.gmra.mxu1 %vm107_vm0, %v2013_v16 }
 0x27f   :  { %v2014_v21 = vmax.f32 %v1760_v19, 0.0  ;;  %v1775_v23 = vadd.f32 %v3520_v20, %v4346_v31 }
 0x280   :  { %v1769_v24 = vpop.f32.mrf.mxu0 }
 0x281   :  { %v1770_v15 = vadd.f32 %v4346_v31, %v1769_v24  ;;  %3619 = vmatprep.mubr.msk.f32.mxu1 %vm107_vm0, %v2014_v21  ;;  %v2017_v28 = vmax.f32 %v1775_v23, 0.0 }
 0x282   :  { %v3523_v26 = vpop.f32.mrf.mxu0  ;;  %3620 = vmatmul.mubr.msk.f32.gmra.mxu1 %vm107_vm0, %v2015_v22 }
 0x283   :  { %v2016_v27 = vmax.f32 %v1770_v15, 0.0  ;;  %v1785_v29 = vadd.f32 %v3523_v26, %v4346_v31 }
 0x284   :  { %v1779_v30 = vpop.f32.mrf.mxu0 }
 0x285   :  { %v1780_v32 = vadd.f32 %v4346_v31, %v1779_v30  ;;  %3622 = vmatprep.mubr.msk.f32.mxu1 %vm107_vm0, %v2016_v27  ;;  %v2019_v25 = vmax.f32 %v1785_v29, 0.0 }
 0x286   :  { %v3526_v33 = vpop.f32.mrf.mxu0  ;;  %3623 = vmatmul.mubr.msk.f32.gmra.mxu1 %vm107_vm0, %v2017_v28 }
 0x287   :  { %v2018_v34 = vmax.f32 %v1780_v32, 0.0  ;;  %v1795_v35 = vadd.f32 %v3526_v33, %v4346_v31 }
 0x288   :  { %v1789_v36 = vpop.f32.mrf.mxu0 }
 0x289   :  { %v1790_v37 = vadd.f32 %v4346_v31, %v1789_v36  ;;  %3625 = vmatprep.mubr.msk.f32.mxu1 %vm107_vm0, %v2018_v34  ;;  %v2021_v40 = vmax.f32 %v1795_v35, 0.0 }
 0x28a   :  { %v3529_v38 = vpop.f32.mrf.mxu0  ;;  %3626 = vmatmul.mubr.msk.f32.gmra.mxu1 %vm107_vm0, %v2019_v25 }
 0x28b   :  { %v2020_v39 = vmax.f32 %v1790_v37, 0.0  ;;  %v1805_v41 = vadd.f32 %v3529_v38, %v4346_v31 }
 0x28c   :  { %v1799_v42 = vpop.f32.mrf.mxu0 }
 0x28d   :  { %v1800_v43 = vadd.f32 %v4346_v31, %v1799_v42  ;;  %3628 = vmatprep.mubr.msk.f32.mxu1 %vm107_vm0, %v2020_v39  ;;  %v2023_v46 = vmax.f32 %v1805_v41, 0.0 }
 0x28e   :  { %v3532_v44 = vpop.f32.mrf.mxu0  ;;  %3629 = vmatmul.mubr.msk.f32.gmra.mxu1 %vm107_vm0, %v2021_v40 }
 0x28f   :  { %v2022_v45 = vmax.f32 %v1800_v43, 0.0  ;;  %v1815_v47 = vadd.f32 %v3532_v44, %v4346_v31 }
 0x290   :  { %v1809_v48 = vpop.f32.mrf.mxu0 }
 0x291   :  { %v1810_v49 = vadd.f32 %v4346_v31, %v1809_v48  ;;  %3631 = vmatprep.mubr.msk.f32.mxu1 %vm107_vm0, %v2022_v45  ;;  %v2025_v52 = vmax.f32 %v1815_v47, 0.0 }
 0x292   :  { %v3535_v50 = vpop.f32.mrf.mxu0  ;;  %3632 = vmatmul.mubr.msk.f32.gmra.mxu1 %vm107_vm0, %v2023_v46 }
 0x293   :  { %v2024_v51 = vmax.f32 %v1810_v49, 0.0  ;;  %v1825_v53 = vadd.f32 %v3535_v50, %v4346_v31 }
 0x294   :  { %v1819_v54 = vpop.f32.mrf.mxu0 }
 0x295   :  { %v1820_v55 = vadd.f32 %v4346_v31, %v1819_v54  ;;  %3634 = vmatprep.mubr.msk.f32.mxu1 %vm107_vm0, %v2024_v51  ;;  %v2027_v58 = vmax.f32 %v1825_v53, 0.0 }
 0x296   :  { %v3538_v56 = vpop.f32.mrf.mxu0  ;;  %3635 = vmatmul.mubr.msk.f32.gmra.mxu1 %vm107_vm0, %v2025_v52 }
 0x297   :  { %v2026_v57 = vmax.f32 %v1820_v55, 0.0  ;;  %v1835_v59 = vadd.f32 %v3538_v56, %v4346_v31 }
 0x298   :  { %v1829_v60 = vpop.f32.mrf.mxu0 }
 0x299   :  { %v1830_v61 = vadd.f32 %v4346_v31, %v1829_v60  ;;  %3637 = vmatprep.mubr.msk.f32.mxu1 %vm107_vm0, %v2026_v57  ;;  %v2029_v0 = vmax.f32 %v1835_v59, 0.0 }
 0x29a   :  { %v3541_v62 = vpop.f32.mrf.mxu0  ;;  %3638 = vmatmul.mubr.msk.f32.gmra.mxu1 %vm107_vm0, %v2027_v58 }
 0x29b   :  { %v2028_v63 = vmax.f32 %v1830_v61, 0.0  ;;  %v1845_v1 = vadd.f32 %v3541_v62, %v4346_v31 }
 0x29c   :  { %v1839_v2 = vpop.f32.mrf.mxu0 }
 0x29d   :  { %v1840_v3 = vadd.f32 %v4346_v31, %v1839_v2  ;;  %3640 = vmatprep.mubr.msk.f32.mxu1 %vm107_vm0, %v2028_v63  ;;  %v2031_v6 = vmax.f32 %v1845_v1, 0.0 }
 0x29e   :  { %v3544_v4 = vpop.f32.mrf.mxu0  ;;  %3641 = vmatmul.mubr.msk.f32.gmra.mxu1 %vm107_vm0, %v2029_v0 }
 0x29f   :  { %v2030_v5 = vmax.f32 %v1840_v3, 0.0  ;;  %v1855_v7 = vadd.f32 %v3544_v4, %v4346_v31 }
 0x2a0   :  { %v1849_v8 = vpop.f32.mrf.mxu0 }
 0x2a1   :  { %v1850_v9 = vadd.f32 %v4346_v31, %v1849_v8  ;;  %3643 = vmatprep.mubr.msk.f32.mxu1 %vm107_vm0, %v2030_v5  ;;  %v2033_v12 = vmax.f32 %v1855_v7, 0.0 }
 0x2a2   :  { %v3547_v10 = vpop.f32.mrf.mxu0  ;;  %3644 = vmatmul.mubr.msk.f32.gmra.mxu1 %vm107_vm0, %v2031_v6 }
 0x2a3   :  { %v2032_v11 = vmax.f32 %v1850_v9, 0.0  ;;  %v1865_v13 = vadd.f32 %v3547_v10, %v4346_v31 }
 0x2a4   :  { %v1859_v14 = vpop.f32.mrf.mxu0 }
 0x2a5   :  { %v1860_v16 = vadd.f32 %v4346_v31, %v1859_v14  ;;  %3646 = vmatprep.mubr.msk.f32.mxu1 %vm107_vm0, %v2032_v11  ;;  %v2035_v19 = vmax.f32 %v1865_v13, 0.0 }
 0x2a6   :  { %v3550_v17 = vpop.f32.mrf.mxu0  ;;  %3647 = vmatmul.mubr.msk.f32.gmra.mxu1 %vm107_vm0, %v2033_v12 }
 0x2a7   :  { %v2034_v18 = vmax.f32 %v1860_v16, 0.0  ;;  %v1875_v20 = vadd.f32 %v3550_v17, %v4346_v31 }
 0x2a8   :  { %v1869_v21 = vpop.f32.mrf.mxu0 }
 0x2a9   :  { %v1870_v22 = vadd.f32 %v4346_v31, %v1869_v21  ;;  %3649 = vmatprep.mubr.msk.f32.mxu1 %vm107_vm0, %v2034_v18  ;;  %v2037_v15 = vmax.f32 %v1875_v20, 0.0 }
 0x2aa   :  { %v3553_v23 = vpop.f32.mrf.mxu0  ;;  %3650 = vmatmul.mubr.msk.f32.gmra.mxu1 %vm107_vm0, %v2035_v19 }
 0x2ab   :  { %v2036_v24 = vmax.f32 %v1870_v22, 0.0  ;;  %v1885_v26 = vadd.f32 %v3553_v23, %v4346_v31 }
 0x2ac   :  { %v1879_v27 = vpop.f32.mrf.mxu0 }
 0x2ad   :  { %v1880_v28 = vadd.f32 %v4346_v31, %v1879_v27  ;;  %3652 = vmatprep.mubr.msk.f32.mxu1 %vm107_vm0, %v2036_v24  ;;  %v2039_v32 = vmax.f32 %v1885_v26, 0.0 }
 0x2ae   :  { %v3556_v29 = vpop.f32.mrf.mxu0  ;;  %3653 = vmatmul.mubr.msk.f32.gmra.mxu1 %vm107_vm0, %v2037_v15 }
 0x2af   :  { %v2038_v30 = vmax.f32 %v1880_v28, 0.0  ;;  %v1895_v33 = vadd.f32 %v3556_v29, %v4346_v31 }
 0x2b0   :  { %v1889_v34 = vpop.f32.mrf.mxu0 }
 0x2b1   :  { %v1890_v25 = vadd.f32 %v4346_v31, %v1889_v34  ;;  %3655 = vmatprep.mubr.msk.f32.mxu1 %vm107_vm0, %v2038_v30  ;;  %v2041_v37 = vmax.f32 %v1895_v33, 0.0 }
 0x2b2   :  { %v3559_v35 = vpop.f32.mrf.mxu0  ;;  %3656 = vmatmul.mubr.msk.f32.gmra.mxu1 %vm107_vm0, %v2039_v32 }
 0x2b3   :  { %v2040_v36 = vmax.f32 %v1890_v25, 0.0  ;;  %v1905_v38 = vadd.f32 %v3559_v35, %v4346_v31  ;;  %v4479_v25 = vld [vmem:[%s4809_s8] ss:$0 sm:$0xff] }
 0x2b4   :  { %v1899_v39 = vpop.f32.mrf.mxu0 }
 0x2b5   :  { %v1900_v40 = vadd.f32 %v4346_v31, %v1899_v39  ;;  %3658 = vmatprep.mubr.msk.f32.mxu1 %vm107_vm0, %v2040_v36  ;;  %v2043_v43 = vmax.f32 %v1905_v38, 0.0 }
 0x2b6   :  { %v3562_v41 = vpop.f32.mrf.mxu0  ;;  %3659 = vmatmul.mubr.msk.f32.gmra.mxu1 %vm107_vm0, %v2041_v37 }
 0x2b7   :  { %v2042_v42 = vmax.f32 %v1900_v40, 0.0  ;;  %v1915_v44 = vadd.f32 %v3562_v41, %v4346_v31 }
 0x2b8   :  { %v1909_v45 = vpop.f32.mrf.mxu0 }
 0x2b9   :  { %v1910_v46 = vadd.f32 %v4346_v31, %v1909_v45  ;;  %3661 = vmatprep.mubr.msk.f32.mxu1 %vm107_vm0, %v2042_v42  ;;  %v2045_v49 = vmax.f32 %v1915_v44, 0.0 }
 0x2ba   :  { %v3565_v47 = vpop.f32.mrf.mxu0  ;;  %3662 = vmatmul.mubr.msk.f32.gmra.mxu1 %vm107_vm0, %v2043_v43 }
 0x2bb   :  { %v2044_v48 = vmax.f32 %v1910_v46, 0.0  ;;  %v1925_v50 = vadd.f32 %v3565_v47, %v4346_v31 }
 0x2bc   :  { %v1919_v51 = vpop.f32.mrf.mxu0 }
 0x2bd   :  { %v1920_v52 = vadd.f32 %v4346_v31, %v1919_v51  ;;  %3664 = vmatprep.mubr.msk.f32.mxu1 %vm107_vm0, %v2044_v48  ;;  %v2047_v55 = vmax.f32 %v1925_v50, 0.0 }
 0x2be   :  { %v3568_v53 = vpop.f32.mrf.mxu0  ;;  %3665 = vmatmul.mubr.msk.f32.gmra.mxu1 %vm107_vm0, %v2045_v49 }
 0x2bf   :  { %v2046_v54 = vmax.f32 %v1920_v52, 0.0  ;;  %v1935_v56 = vadd.f32 %v3568_v53, %v4346_v31 }
 0x2c0   :  { %v1929_v57 = vpop.f32.mrf.mxu0 }
 0x2c1   :  { %v1930_v58 = vadd.f32 %v4346_v31, %v1929_v57  ;;  %3667 = vmatprep.mubr.msk.f32.mxu1 %vm107_vm0, %v2046_v54  ;;  %v2049_v61 = vmax.f32 %v1935_v56, 0.0 }
 0x2c2   :  { %v3571_v59 = vpop.f32.mrf.mxu0  ;;  %3668 = vmatmul.mubr.msk.f32.gmra.mxu1 %vm107_vm0, %v2047_v55 }
 0x2c3   :  { %v2048_v60 = vmax.f32 %v1930_v58, 0.0  ;;  %v1945_v62 = vadd.f32 %v3571_v59, %v4346_v31 }
 0x2c4   :  { %v1939_v63 = vpop.f32.mrf.mxu0 }
 0x2c5   :  { %v1940_v0 = vadd.f32 %v4346_v31, %v1939_v63  ;;  %3670 = vmatprep.mubr.msk.f32.mxu1 %vm107_vm0, %v2048_v60  ;;  %v2051_v3 = vmax.f32 %v1945_v62, 0.0 }
 0x2c6   :  { %v3574_v1 = vpop.f32.mrf.mxu0  ;;  %3671 = vmatmul.mubr.msk.f32.gmra.mxu1 %vm107_vm0, %v2049_v61 }
 0x2c7   :  { %v2050_v2 = vmax.f32 %v1940_v0, 0.0  ;;  %v1955_v4 = vadd.f32 %v3574_v1, %v4346_v31 }
 0x2c8   :  { %v1949_v5 = vpop.f32.mrf.mxu0 }
 0x2c9   :  { %v1950_v6 = vadd.f32 %v4346_v31, %v1949_v5  ;;  %3673 = vmatprep.mubr.msk.f32.mxu1 %vm107_vm0, %v2050_v2  ;;  %v2053_v9 = vmax.f32 %v1955_v4, 0.0 }
 0x2ca   :  { %v3577_v7 = vpop.f32.mrf.mxu0  ;;  %3674 = vmatmul.mubr.msk.f32.gmra.mxu1 %vm107_vm0, %v2051_v3 }
 0x2cb   :  { %v2052_v8 = vmax.f32 %v1950_v6, 0.0  ;;  %v1965_v10 = vadd.f32 %v3577_v7, %v4346_v31 }
 0x2cc   :  { %v1959_v11 = vpop.f32.mrf.mxu0 }
 0x2cd   :  { %v1960_v12 = vadd.f32 %v4346_v31, %v1959_v11  ;;  %3676 = vmatprep.mubr.msk.f32.mxu1 %vm107_vm0, %v2052_v8  ;;  %v2055_v16 = vmax.f32 %v1965_v10, 0.0 }
 0x2ce   :  { %v3580_v13 = vpop.f32.mrf.mxu0  ;;  %3677 = vmatmul.mubr.msk.f32.gmra.mxu1 %vm107_vm0, %v2053_v9 }
 0x2cf   :  { %v2054_v14 = vmax.f32 %v1960_v12, 0.0  ;;  %v1975_v17 = vadd.f32 %v3580_v13, %v4346_v31 }
 0x2d0   :  { %v1969_v18 = vpop.f32.mrf.mxu0 }
 0x2d1   :  { %v1970_v19 = vadd.f32 %v4346_v31, %v1969_v18  ;;  %3679 = vmatprep.mubr.msk.f32.mxu1 %vm107_vm0, %v2054_v14  ;;  %v2057_v22 = vmax.f32 %v1975_v17, 0.0 }
 0x2d2   :  { %v3583_v20 = vpop.f32.mrf.mxu0  ;;  %3680 = vmatmul.mubr.msk.f32.gmra.mxu1 %vm107_vm0, %v2055_v16 }
 0x2d3   :  { %v2056_v21 = vmax.f32 %v1970_v19, 0.0  ;;  %v1985_v23 = vadd.f32 %v3583_v20, %v4346_v31 }
 0x2d4   :  { %v1979_v24 = vpop.f32.mrf.mxu0 }
 0x2d5   :  { %v1980_v15 = vadd.f32 %v4346_v31, %v1979_v24  ;;  %3682 = vmatprep.mubr.msk.f32.mxu1 %vm107_vm0, %v2056_v21  ;;  %v2059_v28 = vmax.f32 %v1985_v23, 0.0 }
 0x2d6   :  { %v3586_v26 = vpop.f32.mrf.mxu0  ;;  %3683 = vmatmul.mubr.msk.f32.gmra.mxu1 %vm107_vm0, %v2057_v22 }
 0x2d7   :  { %v2058_v27 = vmax.f32 %v1980_v15, 0.0  ;;  %v1995_v29 = vadd.f32 %v3586_v26, %v4346_v31 }
 0x2d8   :  { %v1989_v30 = vpop.f32.mrf.mxu0 }
 0x2d9   :  { %v1990_v32 = vadd.f32 %v4346_v31, %v1989_v30  ;;  %3685 = vmatprep.mubr.msk.f32.mxu1 %vm107_vm0, %v2058_v27  ;;  %v2061_v34 = vmax.f32 %v1995_v29, 0.0 }
 0x2da   :  { %3686 = vmatmul.mubr.msk.f32.gmra.mxu1 %vm107_vm0, %v2059_v28 }
 0x2db   :  { %v2060_v33 = vmax.f32 %v1990_v32, 0.0 }
 0x2dd   :  { %3688 = vmatprep.mubr.msk.f32.mxu1 %vm107_vm0, %v2060_v33 }
 0x2de   :  { %3689 = vmatmul.mubr.msk.f32.gmra.mxu1 %vm107_vm0, %v2061_v34 }
 0x322   :  { %v3597_v35 = vpop.f32.mrf.mxu0 }
 0x323   :  { %v2337_v36 = vadd.f32 %v3597_v35, %v4479_v25 }
 0x324   :  { %v2331_v31 = vpop.f32.mrf.mxu0 }
 0x325   :  { %2652 = vst.msk [vmem:[%s4810_s9 + $0x8] sm:$0xff] %vm2650_vm2, %v2337_v36  ;;  %v2332_v37 = vadd.f32 %v4479_v25, %v2331_v31 }
 0x326   :  { %v3600_v38 = vpop.f32.mrf.mxu1 }
 0x327   :  { %2651 = vst.msk [vmem:[%s4810_s9] sm:$0xff] %vm2650_vm2, %v2332_v37  ;;  %v2347_v39 = vadd.f32 %v3600_v38, %v4479_v25 }
 0x328   :  { %v2341_v40 = vpop.f32.mrf.mxu1 }
 0x329   :  { %2654 = vst.msk [vmem:[%s4810_s9 + $0x18] sm:$0xff] %vm2650_vm2, %v2347_v39  ;;  %v2342_v41 = vadd.f32 %v4479_v25, %v2341_v40 }
 0x32a   :  { %v3603_v42 = vpop.f32.mrf.mxu1 }
 0x32b   :  { %2653 = vst.msk [vmem:[%s4810_s9 + $0x10] sm:$0xff] %vm2650_vm2, %v2342_v41  ;;  %v2357_v43 = vadd.f32 %v3603_v42, %v4479_v25 }
 0x32c   :  { %v2351_v44 = vpop.f32.mrf.mxu1 }
 0x32d   :  { %2656 = vst.msk [vmem:[%s4810_s9 + $0x28] sm:$0xff] %vm2650_vm2, %v2357_v43  ;;  %v2352_v45 = vadd.f32 %v4479_v25, %v2351_v44 }
 0x32e   :  { %v3606_v46 = vpop.f32.mrf.mxu1 }
 0x32f   :  { %2655 = vst.msk [vmem:[%s4810_s9 + $0x20] sm:$0xff] %vm2650_vm2, %v2352_v45  ;;  %v2367_v47 = vadd.f32 %v3606_v46, %v4479_v25 }
 0x330   :  { %v2361_v48 = vpop.f32.mrf.mxu1 }
 0x331   :  { %2658 = vst.msk [vmem:[%s4810_s9 + $0x38] sm:$0xff] %vm2650_vm2, %v2367_v47  ;;  %v2362_v49 = vadd.f32 %v4479_v25, %v2361_v48 }
 0x332   :  { %v3609_v50 = vpop.f32.mrf.mxu1 }
 0x333   :  { %2657 = vst.msk [vmem:[%s4810_s9 + $0x30] sm:$0xff] %vm2650_vm2, %v2362_v49  ;;  %v2377_v51 = vadd.f32 %v3609_v50, %v4479_v25 }
 0x334   :  { %v2371_v52 = vpop.f32.mrf.mxu1 }
 0x335   :  { %2660 = vst.msk [vmem:[%s4810_s9 + $0x48] sm:$0xff] %vm2650_vm2, %v2377_v51  ;;  %v2372_v53 = vadd.f32 %v4479_v25, %v2371_v52 }
 0x336   :  { %v3612_v54 = vpop.f32.mrf.mxu1 }
 0x337   :  { %2659 = vst.msk [vmem:[%s4810_s9 + $0x40] sm:$0xff] %vm2650_vm2, %v2372_v53  ;;  %v2387_v55 = vadd.f32 %v3612_v54, %v4479_v25 }
 0x338   :  { %v2381_v56 = vpop.f32.mrf.mxu1 }
 0x339   :  { %2662 = vst.msk [vmem:[%s4810_s9 + $0x58] sm:$0xff] %vm2650_vm2, %v2387_v55  ;;  %v2382_v57 = vadd.f32 %v4479_v25, %v2381_v56 }
 0x33a   :  { %v3615_v58 = vpop.f32.mrf.mxu1 }
 0x33b   :  { %2661 = vst.msk [vmem:[%s4810_s9 + $0x50] sm:$0xff] %vm2650_vm2, %v2382_v57  ;;  %v2397_v59 = vadd.f32 %v3615_v58, %v4479_v25 }
 0x33c   :  { %v2391_v60 = vpop.f32.mrf.mxu1 }
 0x33d   :  { %2664 = vst.msk [vmem:[%s4810_s9 + $0x68] sm:$0xff] %vm2650_vm2, %v2397_v59  ;;  %v2392_v61 = vadd.f32 %v4479_v25, %v2391_v60 }
 0x33e   :  { %v3618_v62 = vpop.f32.mrf.mxu1 }
 0x33f   :  { %2663 = vst.msk [vmem:[%s4810_s9 + $0x60] sm:$0xff] %vm2650_vm2, %v2392_v61  ;;  %v2407_v63 = vadd.f32 %v3618_v62, %v4479_v25 }
 0x340   :  { %v2401_v0 = vpop.f32.mrf.mxu1 }
 0x341   :  { %2666 = vst.msk [vmem:[%s4810_s9 + $0x78] sm:$0xff] %vm2650_vm2, %v2407_v63  ;;  %v2402_v1 = vadd.f32 %v4479_v25, %v2401_v0 }
 0x342   :  { %v3621_v2 = vpop.f32.mrf.mxu1 }
 0x343   :  { %2665 = vst.msk [vmem:[%s4810_s9 + $0x70] sm:$0xff] %vm2650_vm2, %v2402_v1  ;;  %v2417_v3 = vadd.f32 %v3621_v2, %v4479_v25 }
 0x344   :  { %v2411_v4 = vpop.f32.mrf.mxu1 }
 0x345   :  { %2668 = vst.msk [vmem:[%s4810_s9 + $0x88] sm:$0xff] %vm2650_vm2, %v2417_v3  ;;  %v2412_v5 = vadd.f32 %v4479_v25, %v2411_v4 }
 0x346   :  { %v3624_v6 = vpop.f32.mrf.mxu1 }
 0x347   :  { %2667 = vst.msk [vmem:[%s4810_s9 + $0x80] sm:$0xff] %vm2650_vm2, %v2412_v5  ;;  %v2427_v7 = vadd.f32 %v3624_v6, %v4479_v25 }
 0x348   :  { %v2421_v8 = vpop.f32.mrf.mxu1 }
 0x349   :  { %2670 = vst.msk [vmem:[%s4810_s9 + $0x98] sm:$0xff] %vm2650_vm2, %v2427_v7  ;;  %v2422_v9 = vadd.f32 %v4479_v25, %v2421_v8 }
 0x34a   :  { %v3627_v10 = vpop.f32.mrf.mxu1 }
 0x34b   :  { %2669 = vst.msk [vmem:[%s4810_s9 + $0x90] sm:$0xff] %vm2650_vm2, %v2422_v9  ;;  %v2437_v11 = vadd.f32 %v3627_v10, %v4479_v25 }
 0x34c   :  { %v2431_v12 = vpop.f32.mrf.mxu1 }
 0x34d   :  { %2672 = vst.msk [vmem:[%s4810_s9 + $0xa8] sm:$0xff] %vm2650_vm2, %v2437_v11  ;;  %v2432_v13 = vadd.f32 %v4479_v25, %v2431_v12 }
 0x34e   :  { %v3630_v14 = vpop.f32.mrf.mxu1 }
 0x34f   :  { %2671 = vst.msk [vmem:[%s4810_s9 + $0xa0] sm:$0xff] %vm2650_vm2, %v2432_v13  ;;  %v2447_v16 = vadd.f32 %v3630_v14, %v4479_v25 }
 0x350   :  { %v2441_v17 = vpop.f32.mrf.mxu1 }
 0x351   :  { %2674 = vst.msk [vmem:[%s4810_s9 + $0xb8] sm:$0xff] %vm2650_vm2, %v2447_v16  ;;  %v2442_v18 = vadd.f32 %v4479_v25, %v2441_v17 }
 0x352   :  { %v3633_v19 = vpop.f32.mrf.mxu1 }
 0x353   :  { %2673 = vst.msk [vmem:[%s4810_s9 + $0xb0] sm:$0xff] %vm2650_vm2, %v2442_v18  ;;  %v2457_v20 = vadd.f32 %v3633_v19, %v4479_v25 }
 0x354   :  { %v2451_v21 = vpop.f32.mrf.mxu1 }
 0x355   :  { %2676 = vst.msk [vmem:[%s4810_s9 + $0xc8] sm:$0xff] %vm2650_vm2, %v2457_v20  ;;  %v2452_v22 = vadd.f32 %v4479_v25, %v2451_v21 }
 0x356   :  { %v3636_v23 = vpop.f32.mrf.mxu1 }
 0x357   :  { %2675 = vst.msk [vmem:[%s4810_s9 + $0xc0] sm:$0xff] %vm2650_vm2, %v2452_v22  ;;  %v2467_v24 = vadd.f32 %v3636_v23, %v4479_v25 }
 0x358   :  { %v2461_v15 = vpop.f32.mrf.mxu1 }
 0x359   :  { %2678 = vst.msk [vmem:[%s4810_s9 + $0xd8] sm:$0xff] %vm2650_vm2, %v2467_v24  ;;  %v2462_v26 = vadd.f32 %v4479_v25, %v2461_v15 }
 0x35a   :  { %v3639_v27 = vpop.f32.mrf.mxu1 }
 0x35b   :  { %2677 = vst.msk [vmem:[%s4810_s9 + $0xd0] sm:$0xff] %vm2650_vm2, %v2462_v26  ;;  %v2477_v28 = vadd.f32 %v3639_v27, %v4479_v25 }
 0x35c   :  { %v2471_v29 = vpop.f32.mrf.mxu1 }
 0x35d   :  { %2680 = vst.msk [vmem:[%s4810_s9 + $0xe8] sm:$0xff] %vm2650_vm2, %v2477_v28  ;;  %v2472_v30 = vadd.f32 %v4479_v25, %v2471_v29 }
 0x35e   :  { %v3642_v32 = vpop.f32.mrf.mxu1 }
 0x35f   :  { %2679 = vst.msk [vmem:[%s4810_s9 + $0xe0] sm:$0xff] %vm2650_vm2, %v2472_v30  ;;  %v2487_v33 = vadd.f32 %v3642_v32, %v4479_v25 }
 0x360   :  { %v2481_v34 = vpop.f32.mrf.mxu1 }
 0x361   :  { %2682 = vst.msk [vmem:[%s4810_s9 + $0xf8] sm:$0xff] %vm2650_vm2, %v2487_v33  ;;  %v2482_v35 = vadd.f32 %v4479_v25, %v2481_v34 }
 0x362   :  { %v3645_v36 = vpop.f32.mrf.mxu1 }
 0x363   :  { %2681 = vst.msk [vmem:[%s4810_s9 + $0xf0] sm:$0xff] %vm2650_vm2, %v2482_v35  ;;  %v2497_v31 = vadd.f32 %v3645_v36, %v4479_v25 }
 0x364   :  { %v2491_v37 = vpop.f32.mrf.mxu1 }
 0x365   :  { %2684 = vst.msk [vmem:[%s4810_s9 + $0x108] sm:$0xff] %vm2650_vm2, %v2497_v31  ;;  %v2492_v38 = vadd.f32 %v4479_v25, %v2491_v37 }
 0x366   :  { %v3648_v39 = vpop.f32.mrf.mxu1 }
 0x367   :  { %2683 = vst.msk [vmem:[%s4810_s9 + $0x100] sm:$0xff] %vm2650_vm2, %v2492_v38  ;;  %v2507_v40 = vadd.f32 %v3648_v39, %v4479_v25 }
 0x368   :  { %v2501_v41 = vpop.f32.mrf.mxu1 }
 0x369   :  { %2686 = vst.msk [vmem:[%s4810_s9 + $0x118] sm:$0xff] %vm2650_vm2, %v2507_v40  ;;  %v2502_v42 = vadd.f32 %v4479_v25, %v2501_v41 }
 0x36a   :  { %v3651_v43 = vpop.f32.mrf.mxu1 }
 0x36b   :  { %2685 = vst.msk [vmem:[%s4810_s9 + $0x110] sm:$0xff] %vm2650_vm2, %v2502_v42  ;;  %v2517_v44 = vadd.f32 %v3651_v43, %v4479_v25 }
 0x36c   :  { %v2511_v45 = vpop.f32.mrf.mxu1 }
 0x36d   :  { %2688 = vst.msk [vmem:[%s4810_s9 + $0x128] sm:$0xff] %vm2650_vm2, %v2517_v44  ;;  %v2512_v46 = vadd.f32 %v4479_v25, %v2511_v45 }
 0x36e   :  { %v3654_v47 = vpop.f32.mrf.mxu1 }
 0x36f   :  { %2687 = vst.msk [vmem:[%s4810_s9 + $0x120] sm:$0xff] %vm2650_vm2, %v2512_v46  ;;  %v2527_v48 = vadd.f32 %v3654_v47, %v4479_v25 }
 0x370   :  { %v2521_v49 = vpop.f32.mrf.mxu1 }
 0x371   :  { %2690 = vst.msk [vmem:[%s4810_s9 + $0x138] sm:$0xff] %vm2650_vm2, %v2527_v48  ;;  %v2522_v50 = vadd.f32 %v4479_v25, %v2521_v49 }
 0x372   :  { %v3657_v51 = vpop.f32.mrf.mxu1 }
 0x373   :  { %2689 = vst.msk [vmem:[%s4810_s9 + $0x130] sm:$0xff] %vm2650_vm2, %v2522_v50  ;;  %v2537_v52 = vadd.f32 %v3657_v51, %v4479_v25 }
 0x374   :  { %v2531_v53 = vpop.f32.mrf.mxu1 }
 0x375   :  { %2692 = vst.msk [vmem:[%s4810_s9 + $0x148] sm:$0xff] %vm2650_vm2, %v2537_v52  ;;  %v2532_v54 = vadd.f32 %v4479_v25, %v2531_v53 }
 0x376   :  { %v3660_v55 = vpop.f32.mrf.mxu1 }
 0x377   :  { %2691 = vst.msk [vmem:[%s4810_s9 + $0x140] sm:$0xff] %vm2650_vm2, %v2532_v54  ;;  %v2547_v56 = vadd.f32 %v3660_v55, %v4479_v25 }
 0x378   :  { %v2541_v57 = vpop.f32.mrf.mxu1 }
 0x379   :  { %2694 = vst.msk [vmem:[%s4810_s9 + $0x158] sm:$0xff] %vm2650_vm2, %v2547_v56  ;;  %v2542_v58 = vadd.f32 %v4479_v25, %v2541_v57 }
 0x37a   :  { %v3663_v59 = vpop.f32.mrf.mxu1 }
 0x37b   :  { %2693 = vst.msk [vmem:[%s4810_s9 + $0x150] sm:$0xff] %vm2650_vm2, %v2542_v58  ;;  %v2557_v60 = vadd.f32 %v3663_v59, %v4479_v25 }
 0x37c   :  { %v2551_v61 = vpop.f32.mrf.mxu1 }
 0x37d   :  { %2696 = vst.msk [vmem:[%s4810_s9 + $0x168] sm:$0xff] %vm2650_vm2, %v2557_v60  ;;  %v2552_v62 = vadd.f32 %v4479_v25, %v2551_v61 }
 0x37e   :  { %v3666_v63 = vpop.f32.mrf.mxu1 }
 0x37f   :  { %2695 = vst.msk [vmem:[%s4810_s9 + $0x160] sm:$0xff] %vm2650_vm2, %v2552_v62  ;;  %v2567_v0 = vadd.f32 %v3666_v63, %v4479_v25 }
 0x380   :  { %v2561_v1 = vpop.f32.mrf.mxu1 }
 0x381   :  { %2698 = vst.msk [vmem:[%s4810_s9 + $0x178] sm:$0xff] %vm2650_vm2, %v2567_v0  ;;  %v2562_v2 = vadd.f32 %v4479_v25, %v2561_v1 }
 0x382   :  { %v3669_v3 = vpop.f32.mrf.mxu1 }
 0x383   :  { %2697 = vst.msk [vmem:[%s4810_s9 + $0x170] sm:$0xff] %vm2650_vm2, %v2562_v2  ;;  %v2577_v4 = vadd.f32 %v3669_v3, %v4479_v25 }
 0x384   :  { %v2571_v5 = vpop.f32.mrf.mxu1 }
 0x385   :  { %2700 = vst.msk [vmem:[%s4810_s9 + $0x188] sm:$0xff] %vm2650_vm2, %v2577_v4  ;;  %v2572_v6 = vadd.f32 %v4479_v25, %v2571_v5 }
 0x386   :  { %v3672_v7 = vpop.f32.mrf.mxu1 }
 0x387   :  { %2699 = vst.msk [vmem:[%s4810_s9 + $0x180] sm:$0xff] %vm2650_vm2, %v2572_v6  ;;  %v2587_v8 = vadd.f32 %v3672_v7, %v4479_v25 }
 0x388   :  { %v2581_v9 = vpop.f32.mrf.mxu1 }
 0x389   :  { %2702 = vst.msk [vmem:[%s4810_s9 + $0x198] sm:$0xff] %vm2650_vm2, %v2587_v8  ;;  %v2582_v10 = vadd.f32 %v4479_v25, %v2581_v9 }
 0x38a   :  { %v3675_v11 = vpop.f32.mrf.mxu1 }
 0x38b   :  { %2701 = vst.msk [vmem:[%s4810_s9 + $0x190] sm:$0xff] %vm2650_vm2, %v2582_v10  ;;  %v2597_v12 = vadd.f32 %v3675_v11, %v4479_v25 }
 0x38c   :  { %v2591_v13 = vpop.f32.mrf.mxu1 }
 0x38d   :  { %2704 = vst.msk [vmem:[%s4810_s9 + $0x1a8] sm:$0xff] %vm2650_vm2, %v2597_v12  ;;  %v2592_v14 = vadd.f32 %v4479_v25, %v2591_v13 }
 0x38e   :  { %v3678_v16 = vpop.f32.mrf.mxu1 }
 0x38f   :  { %2703 = vst.msk [vmem:[%s4810_s9 + $0x1a0] sm:$0xff] %vm2650_vm2, %v2592_v14  ;;  %v2607_v17 = vadd.f32 %v3678_v16, %v4479_v25 }
 0x390   :  { %v2601_v18 = vpop.f32.mrf.mxu1 }
 0x391   :  { %2706 = vst.msk [vmem:[%s4810_s9 + $0x1b8] sm:$0xff] %vm2650_vm2, %v2607_v17  ;;  %v2602_v19 = vadd.f32 %v4479_v25, %v2601_v18 }
 0x392   :  { %v3681_v20 = vpop.f32.mrf.mxu1 }
 0x393   :  { %2705 = vst.msk [vmem:[%s4810_s9 + $0x1b0] sm:$0xff] %vm2650_vm2, %v2602_v19  ;;  %v2617_v21 = vadd.f32 %v3681_v20, %v4479_v25 }
 0x394   :  { %v2611_v22 = vpop.f32.mrf.mxu1 }
 0x395   :  { %2708 = vst.msk [vmem:[%s4810_s9 + $0x1c8] sm:$0xff] %vm2650_vm2, %v2617_v21  ;;  %v2612_v23 = vadd.f32 %v4479_v25, %v2611_v22 }
 0x396   :  { %v3684_v24 = vpop.f32.mrf.mxu1 }
 0x397   :  { %2707 = vst.msk [vmem:[%s4810_s9 + $0x1c0] sm:$0xff] %vm2650_vm2, %v2612_v23  ;;  %v2627_v15 = vadd.f32 %v3684_v24, %v4479_v25 }
 0x398   :  { %v2621_v26 = vpop.f32.mrf.mxu1 }
 0x399   :  { %2710 = vst.msk [vmem:[%s4810_s9 + $0x1d8] sm:$0xff] %vm2650_vm2, %v2627_v15  ;;  %v2622_v27 = vadd.f32 %v4479_v25, %v2621_v26 }
 0x39a   :  { %v3687_v28 = vpop.f32.mrf.mxu1 }
 0x39b   :  { %2709 = vst.msk [vmem:[%s4810_s9 + $0x1d0] sm:$0xff] %vm2650_vm2, %v2622_v27  ;;  %v2637_v29 = vadd.f32 %v3687_v28, %v4479_v25 }
 0x39c   :  { %v2631_v30 = vpop.f32.mrf.mxu1 }
 0x39d   :  { %2712 = vst.msk [vmem:[%s4810_s9 + $0x1e8] sm:$0xff] %vm2650_vm2, %v2637_v29  ;;  %v2632_v32 = vadd.f32 %v4479_v25, %v2631_v30 }
 0x39e   :  { %v3690_v33 = vpop.f32.mrf.mxu1 }
 0x39f   :  { %2711 = vst.msk [vmem:[%s4810_s9 + $0x1e0] sm:$0xff] %vm2650_vm2, %v2632_v32  ;;  %v2647_v34 = vadd.f32 %v3690_v33, %v4479_v25 }
 0x3a0   :  { %v2641_v35 = vpop.f32.mrf.mxu1 }
 0x3a1   :  { %2714 = vst.msk [vmem:[%s4810_s9 + $0x1f8] sm:$0xff] %vm2650_vm2, %v2647_v34  ;;  %v2642_v36 = vadd.f32 %v4479_v25, %v2641_v35 }
 0x3a3   :  { %2713 = vst.msk [vmem:[%s4810_s9 + $0x1f0] sm:$0xff] %vm2650_vm2, %v2642_v36 }

</bundles_post_ra>
